<compile_context>
chip_gen: v5e
topology: v5e:2x2
jax: 0.10.0
libtpu: 0.0.40
codegen_flags: <defaults>
</compile_context>

<pallas_src>
import jax
import jax.numpy as jnp
from jax.experimental import pallas as pl
from jax.experimental.pallas import tpu as pltpu

HIDDEN_SIZE = 768


def value_net_kernel(x_ref, w1_ref, b1_ref, w2_ref, b2_ref, o_ref):
    # x:  [TB, H] bf16    w1: [H, H] bf16    b1: [1, H] f32
    # w2: [1, H] f32      b2: (1,) f32 (SMEM scalar)     o: [TB, 1] f32
    h = jnp.dot(x_ref[...], w1_ref[...], preferred_element_type=jnp.float32)
    h = jnp.maximum(h + b1_ref[...], 0.0)                  # bias + ReLU on the VPU
    # fc2 with N=1: VPU elementwise multiply + cross-lane (XLU) reduction
    # instead of a 1-lane-wide MXU matmul.
    y = jnp.sum(h * w2_ref[...], axis=-1, keepdims=True) + b2_ref[0]
    o_ref[...] = y.astype(o_ref.dtype)


def value_network_forward(state, w1_bf16, b1, w2_row, b2):
    """state: [B, H] f32 -> [B, 1] f32.

    w1_bf16: [H, H] bf16 (stored [in, out], i.e. transposed vs. PyTorch)
    b1:      [1, H] f32
    w2_row:  [1, H] f32  (fc2 weight as a row vector)
    b2:      (1,)   f32
    """
    B, H = state.shape
    assert H == HIDDEN_SIZE

    # Batch tile: multiple of 256 for large batches (keeps the 256-wide MXU of
    # v6e/v7x full); for small batches just round up to the sublane multiple.
    if B >= 256:
        TB = 256
    else:
        TB = max(8, ((B + 7) // 8) * 8)
    n_blocks = pl.cdiv(B, TB)
    B_pad = n_blocks * TB

    x = state.astype(jnp.bfloat16)          # halve the activation DMA, bf16 MXU path
    if B_pad != B:
        x = jnp.pad(x, ((0, B_pad - B), (0, 0)))

    out = pl.pallas_call(
        value_net_kernel,
        out_shape=jax.ShapeDtypeStruct((B_pad, 1), state.dtype),
        grid=(n_blocks,),
        in_specs=[
            pl.BlockSpec((TB, H), lambda i: (i, 0)),   # x tile (pipelined over batch)
            pl.BlockSpec((H, H), lambda i: (0, 0)),    # W1 — constant block: stays VMEM-resident
            pl.BlockSpec((1, H), lambda i: (0, 0)),    # b1
            pl.BlockSpec((1, H), lambda i: (0, 0)),    # w2 row vector
            pl.BlockSpec(memory_space=pltpu.MemorySpace.SMEM),  # b2 scalar in SMEM
        ],
        out_specs=pl.BlockSpec((TB, 1), lambda i: (i, 0)),
        compiler_params=pltpu.CompilerParams(
            dimension_semantics=("parallel",),         # v7x: shard batch tiles across both TCs
            vmem_limit_bytes=16 << 20,                 # ~1.2 MB weights + tiles; 16 MiB is plenty
        ),
    )(x, w1_bf16, b1, w2_row, b2)
    return out[:B]


def init_params(key, hidden=HIDDEN_SIZE):
    """Deterministic init mirroring torch.nn.Linear's U(-1/sqrt(fan_in), +)."""
    k1, k2, k3, k4 = jax.random.split(key, 4)
    bound = 1.0 / jnp.sqrt(hidden)
    # fc1 weight stored [in, out] (transposed vs. PyTorch), kept in bf16.
    w1 = jax.random.uniform(k1, (hidden, hidden), jnp.float32, -bound, bound).astype(jnp.bfloat16)
    b1 = jax.random.uniform(k2, (1, hidden), jnp.float32, -bound, bound)
    # fc2 weight as a row vector [1, in]; bias as a length-1 vector.
    w2 = jax.random.uniform(k3, (1, hidden), jnp.float32, -bound, bound)
    b2 = jax.random.uniform(k4, (1,), jnp.float32, -bound, bound)
    return w1, b1, w2, b2


def _reference(state, w1_bf16, b1, w2_row, b2):
    # Same math as the kernel (including bf16 quantization of x and W1).
    x = state.astype(jnp.bfloat16).astype(jnp.float32)
    w1 = w1_bf16.astype(jnp.float32)
    h = jnp.maximum(x @ w1 + b1, 0.0)
    return h @ w2_row.T + b2


if __name__ == "__main__":
    key = jax.random.PRNGKey(0)
    k_params, k_state1, k_state2 = jax.random.split(key, 3)

    w1, b1, w2, b2 = init_params(k_params)

    # Small RL-style batch (single tile).
    B1 = 8
    state1 = jax.random.normal(k_state1, (B1, HIDDEN_SIZE), jnp.float32)
    out1 = jax.block_until_ready(value_network_forward(state1, w1, b1, w2, b2))
    ref1 = _reference(state1, w1, b1, w2, b2)
    assert out1.shape == (B1, 1), out1.shape
    assert jnp.allclose(out1, ref1, atol=1e-3, rtol=1e-3)

    # Larger batch exercising the batch grid (2 tiles of 256) + padding path.
    B2 = 300
    state2 = jax.random.normal(k_state2, (B2, HIDDEN_SIZE), jnp.float32)
    out2 = jax.block_until_ready(value_network_forward(state2, w1, b1, w2, b2))
    ref2 = _reference(state2, w1, b1, w2, b2)
    assert out2.shape == (B2, 1), out2.shape
    assert jnp.allclose(out2, ref2, atol=1e-3, rtol=1e-3)

    print("KERNEL_OK")
</pallas_src>

<mosaic_0001>
module attributes {stable_mosaic.version = 11 : i64} {
  func.func @value_net_kernel(%arg0: i32, %arg1: memref<8x768xbf16, #tpu.memory_space<vmem>>, %arg2: memref<768x768xbf16, #tpu.memory_space<vmem>>, %arg3: memref<1x768xf32, #tpu.memory_space<vmem>>, %arg4: memref<1x768xf32, #tpu.memory_space<vmem>>, %arg5: memref<1xf32, #tpu.memory_space<smem>>, %arg6: memref<8x1xf32, #tpu.memory_space<vmem>>) attributes {dimension_semantics = [#tpu.dimension_semantics<parallel>], iteration_bounds = array<i64: 1>, scalar_prefetch = 0 : i64, scratch_operands = 0 : i64, tpu.core_type = #tpu.core_type<tc>, window_params = [{transform_indices = @transform_0, window_bounds = array<i64: 8, 768>}, {pipeline_mode = #tpu.pipeline_mode<synchronous>, transform_indices = @transform_1, window_bounds = array<i64: 768, 768>}, {pipeline_mode = #tpu.pipeline_mode<synchronous>, transform_indices = @transform_2, window_bounds = array<i64: 1, 768>}, {pipeline_mode = #tpu.pipeline_mode<synchronous>, transform_indices = @transform_3, window_bounds = array<i64: 1, 768>}, {transform_indices = @transform_4, window_bounds = array<i64: 1>}, {transform_indices = @transform_5, window_bounds = array<i64: 8, 1>}]} {
    %c0 = arith.constant 0 : index
    %c0_0 = arith.constant 0 : index
    %0 = vector.load %arg1[%c0, %c0_0] : memref<8x768xbf16, #tpu.memory_space<vmem>>, vector<8x768xbf16>
    %c0_1 = arith.constant 0 : index
    %c0_2 = arith.constant 0 : index
    %1 = vector.load %arg2[%c0_1, %c0_2] : memref<768x768xbf16, #tpu.memory_space<vmem>>, vector<768x768xbf16>
    %cst = arith.constant dense<0.000000e+00> : vector<8x768xf32>
    %2 = tpu.matmul %0, %1, %cst {dimension_numbers = #tpu.dot_dimension_numbers<[1], [0], [0], [1], [0, 0, 1, 1], [], []>} : vector<8x768xbf16>, vector<768x768xbf16>, vector<8x768xf32> -> vector<8x768xf32>
    %c0_3 = arith.constant 0 : index
    %c0_4 = arith.constant 0 : index
    %3 = vector.load %arg3[%c0_3, %c0_4] : memref<1x768xf32, #tpu.memory_space<vmem>>, vector<1x768xf32>
    %4 = vector.broadcast %3 : vector<1x768xf32> to vector<8x768xf32>
    %5 = arith.addf %2, %4 : vector<8x768xf32>
    %cst_5 = arith.constant 0.000000e+00 : f32
    %6 = vector.broadcast %cst_5 : f32 to vector<8x768xf32>
    %7 = arith.maximumf %5, %6 : vector<8x768xf32>
    %c0_6 = arith.constant 0 : index
    %c0_7 = arith.constant 0 : index
    %8 = vector.load %arg4[%c0_6, %c0_7] : memref<1x768xf32, #tpu.memory_space<vmem>>, vector<1x768xf32>
    %9 = vector.broadcast %8 : vector<1x768xf32> to vector<8x768xf32>
    %10 = arith.mulf %7, %9 : vector<8x768xf32>
    %cst_8 = arith.constant dense<0.000000e+00> : vector<8xf32>
    %11 = vector.multi_reduction <add>, %10, %cst_8 [1] : vector<8x768xf32> to vector<8xf32>
    %12 = vector.shape_cast %11 : vector<8xf32> to vector<8x1xf32>
    %c0_9 = arith.constant 0 : index
    %13 = memref.load %arg5[%c0_9] : memref<1xf32, #tpu.memory_space<smem>>
    %14 = vector.broadcast %13 : f32 to vector<8x1xf32>
    %15 = arith.addf %12, %14 : vector<8x1xf32>
    %c0_10 = arith.constant 0 : index
    %c0_11 = arith.constant 0 : index
    %16 = vector.load %arg6[%c0_10, %c0_11] : memref<8x1xf32, #tpu.memory_space<vmem>>, vector<8x1xf32>
    tpu.vector_store %arg6[%c0_10, %c0_11], %15 {strides = array<i32>} : memref<8x1xf32, #tpu.memory_space<vmem>>, vector<8x1xf32>,
    return
  }
  func.func @transform_0(%arg0: i32) -> (i32, i32) {
    %c0_i32 = arith.constant 0 : i32
    %c0_i32_0 = arith.constant 0 : i32
    return %arg0, %c0_i32 : i32, i32
  }
  func.func @transform_1(%arg0: i32) -> (i32, i32) {
    %c0_i32 = arith.constant 0 : i32
    %c0_i32_0 = arith.constant 0 : i32
    %c0_i32_1 = arith.constant 0 : i32
    return %c0_i32, %c0_i32_0 : i32, i32
  }
  func.func @transform_2(%arg0: i32) -> (i32, i32) {
    %c0_i32 = arith.constant 0 : i32
    %c0_i32_0 = arith.constant 0 : i32
    %c0_i32_1 = arith.constant 0 : i32
    return %c0_i32, %c0_i32_0 : i32, i32
  }
  func.func @transform_3(%arg0: i32) -> (i32, i32) {
    %c0_i32 = arith.constant 0 : i32
    %c0_i32_0 = arith.constant 0 : i32
    %c0_i32_1 = arith.constant 0 : i32
    return %c0_i32, %c0_i32_0 : i32, i32
  }
  func.func @transform_4(%arg0: i32) -> i32 {
    %c0_i32 = arith.constant 0 : i32
    %c0_i32_0 = arith.constant 0 : i32
    return %c0_i32 : i32
  }
  func.func @transform_5(%arg0: i32) -> (i32, i32) {
    %c0_i32 = arith.constant 0 : i32
    %c0_i32_0 = arith.constant 0 : i32
    return %arg0, %c0_i32 : i32, i32
  }
}

</mosaic_0001>

<bundles_post_ra>
// kernel: tpu_custom_call.1
= control target key start
LH: loop header
LB: loop body
LE: loop exit
PB: predicated region body
PF: predicated region fallthrough
CT: control target
= control target key end

     0   :  { %11 = vsyncpa [#allocation4], 0  ;;  %s4033_s0 = inlined_call_operand.hbm [shape: bf16[8,768], index: 0, kind: input, shape index: {}]   ;;  %s4034_s1 = inlined_call_operand.hbm [shape: bf16[768,768], index: 1, kind: input, shape index: {}]   ;;  %s4035_s2 = inlined_call_operand.hbm [shape: f32[1,768], index: 2, kind: input, shape index: {}]   ;;  %s4036_s3 = inlined_call_operand.hbm [shape: f32[1,768], index: 3, kind: input, shape index: {}]   ;;  %s4037_s4 = inlined_call_operand.<no memory space> [shape: f32[1], index: 4, kind: input, shape index: {}]   ;;  %s4038_s5 = inlined_call_operand.vmem [shape: f32[8,1], index: 5, kind: output, shape index: {}]  }
   0x1   :  { %12 = vsyncpa [#allocation6], 0  ;;  %s29_s20 = sshll.u32 %s4034_s1, 4  ;;  %s30_s20 = int_to_ptr.hbm [resolvable:$true] %s29_s20 }
   0x2   :  { %13 = vsyncpa [#allocation9], 0  ;;  %s3906_s21 = smov [#allocation5]   ;;  %s19_s25 = sshll.u32 %s4033_s0, 4  ;;  %s20_s25 = int_to_ptr.hbm [resolvable:$true] %s19_s25 }
   0x3   :  { %s31_s22 = sshll.u32 %s3906_s21, 4  ;;  %s3907_s26 = smov 384   ;;  %s32_s22 = int_to_ptr.vmem [resolvable:$true] %s31_s22 }
   0x4   :  { %s3908_s27 = smov 24   ;;  %s3909_s28 = smov [#allocation3]  }
   0x5   :  { %37 = dma.hbm_to_vmem [thread:$0]  %s30_s20, 36864, %s32_s22, [#allocation6], %s3907_s26, %s3907_s26, %s3908_s27  }
   0x6   :  { %s21_s29 = sshll.u32 %s3909_s28, 4  ;;  %s43_s7 = sshll.u32 %s4035_s2, 4  ;;  %s22_s29 = int_to_ptr.vmem [resolvable:$true] %s21_s29  ;;  %s44_s7 = int_to_ptr.hbm [resolvable:$true] %s43_s7 }
   0x7   :  { %24 = dma.hbm_to_vmem [thread:$0]  %s20_s25, 384, %s22_s29, [#allocation4]  }
   0x8   :  { %s54_s9 = sshll.u32 %s4036_s3, 4  ;;  %s3910_s10 = smov [#allocation7]   ;;  %s55_s9 = int_to_ptr.hbm [resolvable:$true] %s54_s9 }
   0x9   :  { %s45_s11 = sshll.u32 %s3910_s10, 4  ;;  %s3911_s0 = smov [#allocation8]   ;;  %s46_s11 = int_to_ptr.vmem [resolvable:$true] %s45_s11 }
   0xa   :  { %48 = dma.hbm_to_vmem [thread:$0]  %s44_s7, 96, %s46_s11, [#allocation6]  }
   0xb   :  { %s56_s12 = sshll.u32 %s3911_s0, 4  ;;  %s57_s12 = int_to_ptr.vmem [resolvable:$true] %s56_s12 }
   0xc   :  { %59 = dma.hbm_to_vmem [thread:$0]  %s55_s9, 96, %s57_s12, [#allocation9]  }
   0xd   :  { %3900 = dma.done.wait [#allocation4], 384  }
   0xe   :  { %3901 = vsyncadd [#allocation4], 4294966912 }
   0xf   :  { %3902 = dma.done.wait [#allocation6], 36960  }
  0x10   :  { %3903 = vsyncadd [#allocation6], 4294930336 }
  0x11   :  { %3904 = dma.done.wait [#allocation9], 96  }
  0x12   :  { %3905 = vsyncadd [#allocation9], 4294967200  ;;  %v2527_v0 = vld [vmem:[#allocation5 + $0x150] sm:$0xf]  ;;  %v3554_v1 = vld [vmem:[#allocation5 + $0x164] sm:$0xf0] }
  0x13   :  { %v2719_v2 = vld [vmem:[#allocation5 + $0x2d0] sm:$0xf]  ;;  %v2528_v3 = vor.u32 %v3554_v1, %v2527_v0  ;;  %v3602_v4 = vld [vmem:[#allocation5 + $0x2e4] sm:$0xf0]  ;;  %v2503_v11 = vld [vmem:[#allocation5 + $0x120] sm:$0xf] }
  0x14   :  { %v2911_v5 = vld [vmem:[#allocation5 + $0x450] sm:$0xf]  ;;  %v3650_v6 = vld [vmem:[#allocation5 + $0x464] sm:$0xf0]  ;;  %v2720_v7 = vor.u32 %v3602_v4, %v2719_v2  ;;  %v3548_v13 = vld [vmem:[#allocation5 + $0x134] sm:$0xf0] }
  0x15   :  { %v2912_v8 = vor.u32 %v3650_v6, %v2911_v5  ;;  %v3103_v9 = vld [vmem:[#allocation5 + $0x5d0] sm:$0xf]  ;;  %v3698_v10 = vld [vmem:[#allocation5 + $0x5e4] sm:$0xf0]  ;;  %1844 = vmatpush.bf16.msra.mxu0 %v2528_v3  ;;  %v2695_v14 = vld [vmem:[#allocation5 + $0x2a0] sm:$0xf]  ;;  %v2504_v16 = vor.u32 %v3548_v13, %v2503_v11 }
  0x16   :  { %v3104_v12 = vor.u32 %v3698_v10, %v3103_v9  ;;  %v3596_v15 = vld [vmem:[#allocation5 + $0x2b4] sm:$0xf0]  ;;  %1857 = vmatpush.bf16.msra.mxu1 %v2720_v7  ;;  %v2887_v18 = vld [vmem:[#allocation5 + $0x420] sm:$0xf]  ;;  %v2479_v23 = vld [vmem:[#allocation5 + $0xf0] sm:$0xf] }
  0x17   :  { %1870 = vmatpush.bf16.msra.mxu2 %v2912_v8  ;;  %v2696_v17 = vor.u32 %v3596_v15, %v2695_v14  ;;  %v3644_v19 = vld [vmem:[#allocation5 + $0x434] sm:$0xf0]  ;;  %v3079_v20 = vld [vmem:[#allocation5 + $0x5a0] sm:$0xf]  ;;  %v3542_v24 = vld [vmem:[#allocation5 + $0x104] sm:$0xf0] }
  0x18   :  { %1883 = vmatpush.bf16.msra.mxu3 %v3104_v12  ;;  %v2888_v21 = vor.u32 %v3644_v19, %v2887_v18  ;;  %v3692_v22 = vld [vmem:[#allocation5 + $0x5b4] sm:$0xf0]  ;;  %v2671_v26 = vld [vmem:[#allocation5 + $0x270] sm:$0xf]  ;;  %v3590_v27 = vld [vmem:[#allocation5 + $0x284] sm:$0xf0]  ;;  %v2480_v29 = vor.u32 %v3542_v24, %v2479_v23 }
  0x19   :  { %v3080_v25 = vor.u32 %v3692_v22, %v3079_v20  ;;  %v2863_v28 = vld [vmem:[#allocation5 + $0x3f0] sm:$0xf]  ;;  %1845 = vmatpush.bf16.msra.mxu0 %v2504_v16  ;;  %v3638_v30 = vld [vmem:[#allocation5 + $0x404] sm:$0xf0]  ;;  %v2672_v33 = vor.u32 %v3590_v27, %v2671_v26  ;;  %v2455_v35 = vld [vmem:[#allocation5 + $0xc0] sm:$0xf] }
  0x1a   :  { %v3055_v31 = vld [vmem:[#allocation5 + $0x570] sm:$0xf]  ;;  %v3686_v32 = vld [vmem:[#allocation5 + $0x584] sm:$0xf0]  ;;  %1858 = vmatpush.bf16.msra.mxu1 %v2696_v17  ;;  %v2864_v34 = vor.u32 %v3638_v30, %v2863_v28  ;;  %v3536_v36 = vld [vmem:[#allocation5 + $0xd4] sm:$0xf0] }
  0x1b   :  { %1871 = vmatpush.bf16.msra.mxu2 %v2888_v21  ;;  %v2647_v37 = vld [vmem:[#allocation5 + $0x240] sm:$0xf]  ;;  %v3056_v38 = vor.u32 %v3686_v32, %v3055_v31  ;;  %v3584_v39 = vld [vmem:[#allocation5 + $0x254] sm:$0xf0]  ;;  %v2456_v44 = vor.u32 %v3536_v36, %v2455_v35  ;;  %v2431_v47 = vld [vmem:[#allocation5 + $0x90] sm:$0xf] }
  0x1c   :  { %1884 = vmatpush.bf16.msra.mxu3 %v3080_v25  ;;  %v2839_v40 = vld [vmem:[#allocation5 + $0x3c0] sm:$0xf]  ;;  %v3632_v41 = vld [vmem:[#allocation5 + $0x3d4] sm:$0xf0]  ;;  %v2648_v45 = vor.u32 %v3584_v39, %v2647_v37  ;;  %v3530_v48 = vld [vmem:[#allocation5 + $0xa4] sm:$0xf0] }
  0x1d   :  { %v3031_v42 = vld [vmem:[#allocation5 + $0x540] sm:$0xf]  ;;  %v3680_v43 = vld [vmem:[#allocation5 + $0x554] sm:$0xf0]  ;;  %1846 = vmatpush.bf16.msra.mxu0 %v2480_v29  ;;  %v2840_v46 = vor.u32 %v3632_v41, %v2839_v40  ;;  %v2623_v49 = vld [vmem:[#allocation5 + $0x210] sm:$0xf]  ;;  %v2432_v56 = vor.u32 %v3530_v48, %v2431_v47 }
  0x1e   :  { %1859 = vmatpush.bf16.msra.mxu1 %v2672_v33  ;;  %v3032_v50 = vor.u32 %v3680_v43, %v3031_v42  ;;  %v3578_v51 = vld [vmem:[#allocation5 + $0x224] sm:$0xf0]  ;;  %v2815_v52 = vld [vmem:[#allocation5 + $0x390] sm:$0xf]  ;;  %v2407_v59 = vld [vmem:[#allocation5 + $0x60] sm:$0xf] }
  0x1f   :  { %1872 = vmatpush.bf16.msra.mxu2 %v2864_v34  ;;  %v3626_v53 = vld [vmem:[#allocation5 + $0x3a4] sm:$0xf0]  ;;  %v3007_v54 = vld [vmem:[#allocation5 + $0x510] sm:$0xf]  ;;  %v2624_v57 = vor.u32 %v3578_v51, %v2623_v49  ;;  %v3524_v60 = vld [vmem:[#allocation5 + $0x74] sm:$0xf0] }
  0x20   :  { %1885 = vmatpush.bf16.msra.mxu3 %v3056_v38  ;;  %v3674_v55 = vld [vmem:[#allocation5 + $0x524] sm:$0xf0]  ;;  %v2816_v58 = vor.u32 %v3626_v53, %v2815_v52  ;;  %v2599_v61 = vld [vmem:[#allocation5 + $0x1e0] sm:$0xf]  ;;  %v3572_v63 = vld [vmem:[#allocation5 + $0x1f4] sm:$0xf0]  ;;  %v2408_v4 = vor.u32 %v3524_v60, %v2407_v59 }
  0x21   :  { %1847 = vmatpush.bf16.msra.mxu0 %v2456_v44  ;;  %v3008_v62 = vor.u32 %v3674_v55, %v3007_v54  ;;  %v2791_v0 = vld [vmem:[#allocation5 + $0x360] sm:$0xf]  ;;  %v3620_v1 = vld [vmem:[#allocation5 + $0x374] sm:$0xf0]  ;;  %v2600_v5 = vor.u32 %v3572_v63, %v2599_v61  ;;  %v2383_v7 = vld [vmem:[#allocation5 + $0x30] sm:$0xf] }
  0x22   :  { %1860 = vmatpush.bf16.msra.mxu1 %v2648_v45  ;;  %v2983_v2 = vld [vmem:[#allocation5 + $0x4e0] sm:$0xf]  ;;  %v3668_v3 = vld [vmem:[#allocation5 + $0x4f4] sm:$0xf0]  ;;  %v2792_v6 = vor.u32 %v3620_v1, %v2791_v0  ;;  %v3518_v8 = vld [vmem:[#allocation5 + $0x44] sm:$0xf0] }
  0x23   :  { %1873 = vmatpush.bf16.msra.mxu2 %v2840_v46  ;;  %v2575_v9 = vld [vmem:[#allocation5 + $0x1b0] sm:$0xf]  ;;  %v2984_v10 = vor.u32 %v3668_v3, %v2983_v2  ;;  %v3566_v11 = vld [vmem:[#allocation5 + $0x1c4] sm:$0xf0]  ;;  %v2384_v16 = vor.u32 %v3518_v8, %v2383_v7  ;;  %v2359_v17 = vld [vmem:[#allocation5] sm:$0xf] }
  0x24   :  { %1886 = vmatpush.bf16.msra.mxu3 %v3032_v50  ;;  %v2767_v12 = vld [vmem:[#allocation5 + $0x330] sm:$0xf]  ;;  %v3614_v13 = vld [vmem:[#allocation5 + $0x344] sm:$0xf0]  ;;  %v3512_v18 = vld [vmem:[#allocation5 + $0x14] sm:$0xf0]  ;;  %v2576_v19 = vor.u32 %v3566_v11, %v2575_v9 }
  0x25   :  { %1848 = vmatpush.bf16.msra.mxu0 %v2432_v56  ;;  %v2959_v14 = vld [vmem:[#allocation5 + $0x4b0] sm:$0xf]  ;;  %v3662_v15 = vld [vmem:[#allocation5 + $0x4c4] sm:$0xf0]  ;;  %v2768_v20 = vor.u32 %v3614_v13, %v2767_v12  ;;  %v2551_v21 = vld [vmem:[#allocation5 + $0x180] sm:$0xf]  ;;  %v2360_v31 = vor.u32 %v3512_v18, %v2359_v17 }
  0x26   :  { %1861 = vmatpush.bf16.msra.mxu1 %v2624_v57  ;;  %v3560_v22 = vld [vmem:[#allocation5 + $0x194] sm:$0xf0]  ;;  %v2743_v23 = vld [vmem:[#allocation5 + $0x300] sm:$0xf]  ;;  %v2960_v24 = vor.u32 %v3662_v15, %v2959_v14  ;;  %v3295_v28 = vld [vmem:[#allocation5 + $0x750] sm:$0xf] }
  0x27   :  { %1874 = vmatpush.bf16.msra.mxu2 %v2816_v58  ;;  %v3608_v25 = vld [vmem:[#allocation5 + $0x314] sm:$0xf0]  ;;  %v2935_v26 = vld [vmem:[#allocation5 + $0x480] sm:$0xf]  ;;  %v3746_v29 = vld [vmem:[#allocation5 + $0x764] sm:$0xf0]  ;;  %v2552_v35 = vor.u32 %v3560_v22, %v2551_v21 }
  0x28   :  { %1887 = vmatpush.bf16.msra.mxu3 %v3008_v62  ;;  %v3656_v27 = vld [vmem:[#allocation5 + $0x494] sm:$0xf0]  ;;  %v3487_v30 = vld [vmem:[#allocation5 + $0x8d0] sm:$0xf]  ;;  %v3794_v32 = vld [vmem:[#allocation5 + $0x8e4] sm:$0xf0]  ;;  %v2744_v36 = vor.u32 %v3608_v25, %v2743_v23  ;;  %v3296_v40 = vor.u32 %v3746_v29, %v3295_v28 }
  0x29   :  { %1849 = vmatpush.bf16.msra.mxu0 %v2408_v4  ;;  %v3551_v33 = vld [vmem:[#allocation5 + $0x154] sm:$0xf]  ;;  %v2529_v34 = vld [vmem:[#allocation5 + $0x168] sm:$0xf0]  ;;  %v2936_v39 = vor.u32 %v3656_v27, %v2935_v26  ;;  %v3488_v41 = vor.u32 %v3794_v32, %v3487_v30  ;;  %v3271_v43 = vld [vmem:[#allocation5 + $0x720] sm:$0xf] }
  0x2a   :  { %1862 = vmatpush.bf16.msra.mxu1 %v2600_v5  ;;  %v3599_v37 = vld [vmem:[#allocation5 + $0x2d4] sm:$0xf]  ;;  %v2721_v38 = vld [vmem:[#allocation5 + $0x2e8] sm:$0xf0]  ;;  %v2532_v42 = vor.u32 %v3551_v33, %v2529_v34  ;;  %v3740_v44 = vld [vmem:[#allocation5 + $0x734] sm:$0xf0] }
  0x2b   :  { %1875 = vmatpush.bf16.msra.mxu2 %v2792_v6  ;;  %v3463_v45 = vld [vmem:[#allocation5 + $0x8a0] sm:$0xf]  ;;  %v2724_v46 = vor.u32 %v3599_v37, %v2721_v38  ;;  %v3788_v47 = vld [vmem:[#allocation5 + $0x8b4] sm:$0xf0]  ;;  %v3545_v48 = vld [vmem:[#allocation5 + $0x124] sm:$0xf]  ;;  %v3272_v52 = vor.u32 %v3740_v44, %v3271_v43 }
  0x2c   :  { %1888 = vmatpush.bf16.msra.mxu3 %v2984_v10  ;;  %v2505_v49 = vld [vmem:[#allocation5 + $0x138] sm:$0xf0]  ;;  %v3593_v50 = vld [vmem:[#allocation5 + $0x2a4] sm:$0xf]  ;;  %v3247_v53 = vld [vmem:[#allocation5 + $0x6f0] sm:$0xf]  ;;  %v3464_v54 = vor.u32 %v3788_v47, %v3463_v45 }
  0x2d   :  { %1850 = vmatpush.bf16.msra.mxu0 %v2384_v16  ;;  %v2697_v51 = vld [vmem:[#allocation5 + $0x2b8] sm:$0xf0]  ;;  %v2508_v55 = vor.u32 %v3545_v48, %v2505_v49  ;;  %v3734_v56 = vld [vmem:[#allocation5 + $0x704] sm:$0xf0]  ;;  %v3439_v57 = vld [vmem:[#allocation5 + $0x870] sm:$0xf] }
  0x2e   :  { %1863 = vmatpush.bf16.msra.mxu1 %v2576_v19  ;;  %v3782_v58 = vld [vmem:[#allocation5 + $0x884] sm:$0xf0]  ;;  %v2700_v59 = vor.u32 %v3593_v50, %v2697_v51  ;;  %v3539_v60 = vld [vmem:[#allocation5 + $0xf4] sm:$0xf]  ;;  %v2481_v61 = vld [vmem:[#allocation5 + $0x108] sm:$0xf0]  ;;  %v3248_v0 = vor.u32 %v3734_v56, %v3247_v53 }
  0x2f   :  { %1876 = vmatpush.bf16.msra.mxu2 %v2768_v20  ;;  %v3587_v62 = vld [vmem:[#allocation5 + $0x274] sm:$0xf]  ;;  %v2673_v63 = vld [vmem:[#allocation5 + $0x288] sm:$0xf0]  ;;  %v3440_v1 = vor.u32 %v3782_v58, %v3439_v57  ;;  %v2484_v4 = vor.u32 %v3539_v60, %v2481_v61  ;;  %v3223_v5 = vld [vmem:[#allocation5 + $0x6c0] sm:$0xf] }
  0x30   :  { %1889 = vmatpush.bf16.msra.mxu3 %v2960_v24  ;;  %v79_v2 = vld [vmem:[#allocation3 + $0x8] sm:$0xff]  ;;  %v78_v3 = vld [vmem:[#allocation3] sm:$0xff]  ;;  %v3728_v6 = vld [vmem:[#allocation5 + $0x6d4] sm:$0xf0]  ;;  %v2676_v11 = vor.u32 %v3587_v62, %v2673_v63  ;;  %vm2348_vm0 = vcmask 7168  }
  0x31   :  { %1851 = vmatpush.bf16.msra.mxu0 %v2360_v31  ;;  %v3415_v7 = vld [vmem:[#allocation5 + $0x840] sm:$0xf]  ;;  %v388_v8 = vunpack.c.l.b16 %v79_v2  ;;  %v386_v9 = vunpack.c.l.b16 %v78_v3  ;;  %v389_v10 = vunpack.c.h.b16 %v79_v2  ;;  %v3776_v12 = vld [vmem:[#allocation5 + $0x854] sm:$0xf0]  ;;  %v3533_v13 = vld [vmem:[#allocation5 + $0xc4] sm:$0xf]  ;;  %v387_v15 = vunpack.c.h.b16 %v78_v3 }
  0x32   :  { %1864 = vmatpush.bf16.msra.mxu1 %v2552_v35  ;;  %v2457_v14 = vld [vmem:[#allocation5 + $0xd8] sm:$0xf0]  ;;  %v3581_v16 = vld [vmem:[#allocation5 + $0x244] sm:$0xf]  ;;  %v3224_v21 = vor.u32 %v3728_v6, %v3223_v5  ;;  %v3416_v23 = vor.u32 %v3776_v12, %v3415_v7  ;;  %v3199_v25 = vld [vmem:[#allocation5 + $0x690] sm:$0xf] }
  0x33   :  { %1877 = vmatpush.bf16.msra.mxu2 %v2744_v36  ;;  %v2649_v17 = vld [vmem:[#allocation5 + $0x258] sm:$0xf0]  ;;  %v3954_v18 = vpack.c.b16 %v388_v8, %v388_v8  ;;  %v3956_v19 = vpack.c.b16 %v386_v9, %v386_v9  ;;  %v3958_v20 = vpack.c.b16 %v389_v10, %v389_v10  ;;  %v3960_v22 = vpack.c.b16 %v387_v15, %v387_v15  ;;  %v3722_v26 = vld [vmem:[#allocation5 + $0x6a4] sm:$0xf0]  ;;  %v3391_v27 = vld [vmem:[#allocation5 + $0x810] sm:$0xf] }
  0x34   :  { %1890 = vmatpush.bf16.msra.mxu3 %v2936_v39  ;;  %v2460_v24 = vor.u32 %v3533_v13, %v2457_v14  ;;  %v2652_v28 = vor.u32 %v3581_v16, %v2649_v17  ;;  %v3770_v29 = vld [vmem:[#allocation5 + $0x824] sm:$0xf0]  ;;  %v3527_v30 = vld [vmem:[#allocation5 + $0x94] sm:$0xf]  ;;  %v2433_v31 = vld [vmem:[#allocation5 + $0xa8] sm:$0xf0]  ;;  %v3200_v34 = vor.u32 %v3722_v26, %v3199_v25 }
  0x35   :  { %1896 = vmatpush.bf16.msrb.mxu0 %v3296_v40  ;;  %v3575_v32 = vld [vmem:[#allocation5 + $0x214] sm:$0xf]  ;;  %v2625_v33 = vld [vmem:[#allocation5 + $0x228] sm:$0xf0]  ;;  %1865 = vmatmul.bf16.vlgmr.msra.gmra.mxu1 %v3960_v22  ;;  %v3392_v35 = vor.u32 %v3770_v29, %v3391_v27  ;;  %v2436_v36 = vor.u32 %v3527_v30, %v2433_v31  ;;  %v3175_v37 = vld [vmem:[#allocation5 + $0x660] sm:$0xf] }
  0x36   :  { %1909 = vmatpush.bf16.msrb.mxu1 %v3488_v41  ;;  %1878 = vmatmul.bf16.vlgmr.msra.gmra.mxu2 %v3954_v18  ;;  %v3716_v38 = vld [vmem:[#allocation5 + $0x674] sm:$0xf0]  ;;  %v3367_v39 = vld [vmem:[#allocation5 + $0x7e0] sm:$0xf]  ;;  %v2628_v40 = vor.u32 %v3575_v32, %v2625_v33  ;;  %v2409_v43 = vld [vmem:[#allocation5 + $0x78] sm:$0xf0] }
  0x37   :  { %1922 = vmatpush.bf16.msrb.mxu2 %v2532_v42  ;;  %1852 = vmatmul.bf16.vlgmr.msra.gmra.mxu0 %v3956_v19  ;;  %v3764_v41 = vld [vmem:[#allocation5 + $0x7f4] sm:$0xf0]  ;;  %v3521_v42 = vld [vmem:[#allocation5 + $0x64] sm:$0xf]  ;;  %v2601_v45 = vld [vmem:[#allocation5 + $0x1f8] sm:$0xf0] }
  0x38   :  { %1935 = vmatpush.bf16.msrb.mxu3 %v2724_v46  ;;  %v3569_v44 = vld [vmem:[#allocation5 + $0x1e4] sm:$0xf]  ;;  %v3176_v46 = vor.u32 %v3716_v38, %v3175_v37  ;;  %v3368_v47 = vor.u32 %v3764_v41, %v3367_v39  ;;  %v2412_v48 = vor.u32 %v3521_v42, %v2409_v43  ;;  %v3151_v49 = vld [vmem:[#allocation5 + $0x630] sm:$0xf]  ;;  %v3710_v50 = vld [vmem:[#allocation5 + $0x644] sm:$0xf0] }
  0x39   :  { %1897 = vmatpush.bf16.msrb.mxu0 %v3272_v52  ;;  %1891 = vmatmul.bf16.vlgmr.msra.gmra.mxu3 %v3958_v20  ;;  %v3343_v51 = vld [vmem:[#allocation5 + $0x7b0] sm:$0xf]  ;;  %v2604_v52 = vor.u32 %v3569_v44, %v2601_v45  ;;  %v3758_v53 = vld [vmem:[#allocation5 + $0x7c4] sm:$0xf0]  ;;  %v3563_v56 = vld [vmem:[#allocation5 + $0x1b4] sm:$0xf]  ;;  %v3152_v58 = vor.u32 %v3710_v50, %v3151_v49 }
  0x3a   :  { %1910 = vmatpush.bf16.msrb.mxu1 %v3464_v54  ;;  %v3515_v54 = vld [vmem:[#allocation5 + $0x34] sm:$0xf]  ;;  %v2577_v57 = vld [vmem:[#allocation5 + $0x1c8] sm:$0xf0]  ;;  %v3704_v60 = vld [vmem:[#allocation5 + $0x614] sm:$0xf0]  ;;  %v3344_v62 = vor.u32 %v3758_v53, %v3343_v51 }
  0x3b   :  { %1923 = vmatpush.bf16.msrb.mxu2 %v2508_v55  ;;  %v2385_v55 = vld [vmem:[#allocation5 + $0x48] sm:$0xf0]  ;;  %v3319_v61 = vld [vmem:[#allocation5 + $0x780] sm:$0xf]  ;;  %v80_v2 = vld [vmem:[#allocation3 + $0x10] sm:$0xff]  ;;  %v2580_v3 = vor.u32 %v3563_v56, %v2577_v57 }
  0x3c   :  { %1936 = vmatpush.bf16.msrb.mxu3 %v2700_v59  ;;  %v3127_v59 = vld [vmem:[#allocation5 + $0x600] sm:$0xf]  ;;  %v2388_v63 = vor.u32 %v3515_v54, %v2385_v55  ;;  %v3557_v5 = vld [vmem:[#allocation5 + $0x184] sm:$0xf]  ;;  %v2553_v6 = vld [vmem:[#allocation5 + $0x198] sm:$0xf0]  ;;  %v390_v14 = vunpack.c.l.b16 %v80_v2 }
  0x3d   :  { %1898 = vmatpush.bf16.msrb.mxu0 %v3248_v0  ;;  %v3752_v0 = vld [vmem:[#allocation5 + $0x794] sm:$0xf0]  ;;  %v3647_v7 = vld [vmem:[#allocation5 + $0x454] sm:$0xf]  ;;  %v2913_v8 = vld [vmem:[#allocation5 + $0x468] sm:$0xf0]  ;;  %v3128_v10 = vor.u32 %v3704_v60, %v3127_v59 }
  0x3e   :  { %1911 = vmatpush.bf16.msrb.mxu1 %v3440_v1  ;;  %v3509_v1 = vld [vmem:[#allocation5 + $0x4] sm:$0xf]  ;;  %v3695_v9 = vld [vmem:[#allocation5 + $0x5d4] sm:$0xf]  ;;  %v3297_v13 = vld [vmem:[#allocation5 + $0x768] sm:$0xf0]  ;;  %v3320_v15 = vor.u32 %v3752_v0, %v3319_v61  ;;  %v2916_v25 = vor.u32 %v3647_v7, %v2913_v8 }
  0x3f   :  { %1924 = vmatpush.bf16.msrb.mxu2 %v2484_v4  ;;  %v2361_v4 = vld [vmem:[#allocation5 + $0x18] sm:$0xf0]  ;;  %v3743_v12 = vld [vmem:[#allocation5 + $0x754] sm:$0xf]  ;;  %v3689_v30 = vld [vmem:[#allocation5 + $0x5a4] sm:$0xf] }
  0x40   :  { %1937 = vmatpush.bf16.msrb.mxu3 %v2676_v11  ;;  %v3105_v11 = vld [vmem:[#allocation5 + $0x5e8] sm:$0xf0]  ;;  %v2364_v16 = vor.u32 %v3509_v1, %v2361_v4  ;;  %v3791_v17 = vld [vmem:[#allocation5 + $0x8d4] sm:$0xf]  ;;  %v3300_v27 = vor.u32 %v3743_v12, %v3297_v13  ;;  %v2889_v29 = vld [vmem:[#allocation5 + $0x438] sm:$0xf0] }
  0x41   :  { %1899 = vmatpush.bf16.msrb.mxu0 %v3224_v21  ;;  %v3489_v21 = vld [vmem:[#allocation5 + $0x8e8] sm:$0xf0]  ;;  %v3108_v26 = vor.u32 %v3695_v9, %v3105_v11  ;;  %v3081_v32 = vld [vmem:[#allocation5 + $0x5b8] sm:$0xf0]  ;;  %v3737_v33 = vld [vmem:[#allocation5 + $0x724] sm:$0xf] }
  0x42   :  { %1912 = vmatpush.bf16.msrb.mxu1 %v3416_v23  ;;  %v391_v23 = vunpack.c.h.b16 %v80_v2  ;;  %v3492_v31 = vor.u32 %v3791_v17, %v3489_v21  ;;  %v3465_v37 = vld [vmem:[#allocation5 + $0x8b8] sm:$0xf0]  ;;  %v3635_v42 = vld [vmem:[#allocation5 + $0x3f4] sm:$0xf]  ;;  %v2865_v43 = vld [vmem:[#allocation5 + $0x408] sm:$0xf0] }
  0x43   :  { %1925 = vmatpush.bf16.msrb.mxu2 %v2460_v24  ;;  %v2556_v24 = vor.u32 %v3557_v5, %v2553_v6  ;;  %v3683_v44 = vld [vmem:[#allocation5 + $0x574] sm:$0xf]  ;;  %v3441_v50 = vld [vmem:[#allocation5 + $0x888] sm:$0xf0]  ;;  %v2868_v51 = vor.u32 %v3635_v42, %v2865_v43  ;;  %v3629_v54 = vld [vmem:[#allocation5 + $0x3c4] sm:$0xf] }
  0x44   :  { %1938 = vmatpush.bf16.msrb.mxu3 %v2652_v28  ;;  %v3641_v28 = vld [vmem:[#allocation5 + $0x424] sm:$0xf]  ;;  %v3968_v38 = vpack.c.b16 %v391_v23, %v391_v23  ;;  %v3779_v49 = vld [vmem:[#allocation5 + $0x874] sm:$0xf]  ;;  %v2841_v55 = vld [vmem:[#allocation5 + $0x3d8] sm:$0xf0] }
  0x45   :  { %1900 = vmatpush.bf16.msrb.mxu0 %v3200_v34  ;;  %v3273_v34 = vld [vmem:[#allocation5 + $0x738] sm:$0xf0]  ;;  %v2892_v39 = vor.u32 %v3641_v28, %v2889_v29  ;;  %v3677_v56 = vld [vmem:[#allocation5 + $0x544] sm:$0xf]  ;;  %v3444_v57 = vor.u32 %v3779_v49, %v3441_v50  ;;  %v3623_v2 = vld [vmem:[#allocation5 + $0x394] sm:$0xf] }
  0x46   :  { %1913 = vmatpush.bf16.msrb.mxu1 %v3392_v35  ;;  %v3966_v35 = vpack.c.b16 %v390_v14, %v390_v14  ;;  %v3276_v41 = vor.u32 %v3737_v33, %v3273_v34  ;;  %v3725_v59 = vld [vmem:[#allocation5 + $0x6c4] sm:$0xf]  ;;  %v3225_v60 = vld [vmem:[#allocation5 + $0x6d8] sm:$0xf0]  ;;  %v3671_v4 = vld [vmem:[#allocation5 + $0x514] sm:$0xf] }
  0x47   :  { %1926 = vmatpush.bf16.msrb.mxu2 %v2436_v36  ;;  %v3785_v36 = vld [vmem:[#allocation5 + $0x8a4] sm:$0xf]  ;;  %v3228_v1 = vor.u32 %v3725_v59, %v3225_v60  ;;  %v3009_v6 = vld [vmem:[#allocation5 + $0x528] sm:$0xf0]  ;;  %v3719_v7 = vld [vmem:[#allocation5 + $0x694] sm:$0xf] }
  0x48   :  { %1939 = vmatpush.bf16.msrb.mxu3 %v2628_v40  ;;  %v3084_v40 = vor.u32 %v3689_v30, %v3081_v32  ;;  %v3468_v45 = vor.u32 %v3785_v36, %v3465_v37  ;;  %v3773_v61 = vld [vmem:[#allocation5 + $0x844] sm:$0xf]  ;;  %v3201_v8 = vld [vmem:[#allocation5 + $0x6a8] sm:$0xf0]  ;;  %v3767_v9 = vld [vmem:[#allocation5 + $0x814] sm:$0xf]  ;;  %v3012_v12 = vor.u32 %v3671_v4, %v3009_v6 }
  0x49   :  { %1901 = vmatpush.bf16.msrb.mxu0 %v3176_v46  ;;  %v3057_v46 = vld [vmem:[#allocation5 + $0x588] sm:$0xf0]  ;;  %v3204_v13 = vor.u32 %v3719_v7, %v3201_v8  ;;  %v3617_v14 = vld [vmem:[#allocation5 + $0x364] sm:$0xf]  ;;  %v2985_v21 = vld [vmem:[#allocation5 + $0x4f8] sm:$0xf0] }
  0x4a   :  { %1914 = vmatpush.bf16.msrb.mxu1 %v3368_v47  ;;  %v3731_v47 = vld [vmem:[#allocation5 + $0x6f4] sm:$0xf]  ;;  %v3713_v23 = vld [vmem:[#allocation5 + $0x664] sm:$0xf]  ;;  %v2961_v34 = vld [vmem:[#allocation5 + $0x4c8] sm:$0xf0] }
  0x4b   :  { %1927 = vmatpush.bf16.msrb.mxu2 %v2412_v48  ;;  %v3249_v48 = vld [vmem:[#allocation5 + $0x708] sm:$0xf0]  ;;  %v3611_v30 = vld [vmem:[#allocation5 + $0x334] sm:$0xf]  ;;  %v3605_v42 = vld [vmem:[#allocation5 + $0x304] sm:$0xf] }
  0x4c   :  { %1940 = vmatpush.bf16.msrb.mxu3 %v2604_v52  ;;  %v3060_v52 = vor.u32 %v3683_v44, %v3057_v46  ;;  %v3252_v53 = vor.u32 %v3731_v47, %v3249_v48  ;;  %v3659_v32 = vld [vmem:[#allocation5 + $0x4b4] sm:$0xf]  ;;  %v3153_v37 = vld [vmem:[#allocation5 + $0x648] sm:$0xf0]  ;;  %v2745_v43 = vld [vmem:[#allocation5 + $0x318] sm:$0xf0] }
  0x4d   :  { %1902 = vmatpush.bf16.msrb.mxu0 %v3152_v58  ;;  %v3033_v58 = vld [vmem:[#allocation5 + $0x558] sm:$0xf0]  ;;  %v3707_v36 = vld [vmem:[#allocation5 + $0x634] sm:$0xf]  ;;  %v2964_v44 = vor.u32 %v3659_v32, %v2961_v34  ;;  %v3653_v46 = vld [vmem:[#allocation5 + $0x484] sm:$0xf] }
  0x4e   :  { %1915 = vmatpush.bf16.msrb.mxu1 %v3344_v62  ;;  %v3417_v62 = vld [vmem:[#allocation5 + $0x858] sm:$0xf0]  ;;  %v3036_v0 = vor.u32 %v3677_v56, %v3033_v58  ;;  %v3701_v48 = vld [vmem:[#allocation5 + $0x604] sm:$0xf]  ;;  %v2748_v56 = vor.u32 %v3605_v42, %v2745_v43  ;;  %v2919_v58 = vld [vmem:[#allocation5 + $0x458] sm:$0xf] }
  0x4f   :  { %1928 = vmatpush.bf16.msrb.mxu2 %v2388_v63  ;;  %v2844_v63 = vor.u32 %v3629_v54, %v2841_v55  ;;  %v3420_v5 = vor.u32 %v3773_v61, %v3417_v62  ;;  %v2937_v47 = vld [vmem:[#allocation5 + $0x498] sm:$0xf0]  ;;  %v3555_v54 = vld [vmem:[#allocation5 + $0x16c] sm:$0xf0]  ;;  %v2727_v55 = vld [vmem:[#allocation5 + $0x2d8] sm:$0xf] }
  0x50   :  { %1941 = vmatpush.bf16.msrb.mxu3 %v2580_v3  ;;  %v2817_v3 = vld [vmem:[#allocation5 + $0x3a8] sm:$0xf0]  ;;  %v3129_v50 = vld [vmem:[#allocation5 + $0x618] sm:$0xf0]  ;;  %v3651_v59 = vld [vmem:[#allocation5 + $0x46c] sm:$0xf0]  ;;  %v2940_v60 = vor.u32 %v3653_v46, %v2937_v47 }
  0x51   :  { %1903 = vmatpush.bf16.msrb.mxu0 %v3128_v10  ;;  %v3393_v10 = vld [vmem:[#allocation5 + $0x828] sm:$0xf0]  ;;  %v2820_v11 = vor.u32 %v3623_v2, %v2817_v3  ;;  %v3132_v61 = vor.u32 %v3701_v48, %v3129_v50  ;;  %v3111_v62 = vld [vmem:[#allocation5 + $0x5d8] sm:$0xf]  ;;  %v2920_v3 = vor.u32 %v3651_v59, %v2919_v58  ;;  %v2511_v4 = vld [vmem:[#allocation5 + $0x128] sm:$0xf] }
  0x52   :  { %1916 = vmatpush.bf16.msrb.mxu1 %v3320_v15  ;;  %v2793_v15 = vld [vmem:[#allocation5 + $0x378] sm:$0xf0]  ;;  %v3396_v17 = vor.u32 %v3767_v9, %v3393_v10  ;;  %v2703_v6 = vld [vmem:[#allocation5 + $0x2a8] sm:$0xf]  ;;  %v3597_v8 = vld [vmem:[#allocation5 + $0x2bc] sm:$0xf0] }
  0x53   :  { %1929 = vmatpush.bf16.msrb.mxu2 %v2364_v16  ;;  %v3665_v16 = vld [vmem:[#allocation5 + $0x4e4] sm:$0xf]  ;;  %v2895_v9 = vld [vmem:[#allocation5 + $0x428] sm:$0xf]  ;;  %v3645_v10 = vld [vmem:[#allocation5 + $0x43c] sm:$0xf0] }
  0x54   :  { %1942 = vmatpush.bf16.msrb.mxu3 %v2556_v24  ;;  %1904 = vmatmul.bf16.vlgmr.msrb.gmra.mxu0 %v3966_v35  ;;  %v3177_v24 = vld [vmem:[#allocation5 + $0x678] sm:$0xf0]  ;;  %v2988_v28 = vor.u32 %v3665_v16, %v2985_v21  ;;  %v2487_v16 = vld [vmem:[#allocation5 + $0xf8] sm:$0xf]  ;;  %v2463_v32 = vld [vmem:[#allocation5 + $0xc8] sm:$0xf] }
  0x55   :  { %1948 = vmatpush.bf16.msra.mxu0 %v2916_v25  ;;  %1917 = vmatmul.bf16.vlgmr.msrb.gmra.mxu1 %v3968_v38  ;;  %v3761_v25 = vld [vmem:[#allocation5 + $0x7e4] sm:$0xf]  ;;  %v3180_v29 = vor.u32 %v3713_v23, %v3177_v24  ;;  %v2679_v21 = vld [vmem:[#allocation5 + $0x278] sm:$0xf]  ;;  %v3591_v24 = vld [vmem:[#allocation5 + $0x28c] sm:$0xf0] }
  0x56   :  { %1961 = vmatpush.bf16.msra.mxu1 %v3108_v26  ;;  %1930 = vmatmul.bf16.vlgmr.msrb.gmra.mxu2 %v3956_v19  ;;  %v3369_v26 = vld [vmem:[#allocation5 + $0x7f8] sm:$0xf0]  ;;  %v2655_v34 = vld [vmem:[#allocation5 + $0x248] sm:$0xf]  ;;  %v3681_v42 = vld [vmem:[#allocation5 + $0x55c] sm:$0xf0] }
  0x57   :  { %1974 = vmatpush.bf16.msra.mxu2 %v3300_v27  ;;  %1943 = vmatmul.bf16.vlgmr.msrb.gmra.mxu3 %v3960_v22  ;;  %v2796_v27 = vor.u32 %v3617_v14, %v2793_v15  ;;  %v3372_v33 = vor.u32 %v3761_v25, %v3369_v26  ;;  %v2704_v14 = vor.u32 %v3597_v8, %v2703_v6  ;;  %v2871_v25 = vld [vmem:[#allocation5 + $0x3f8] sm:$0xf]  ;;  %v3639_v26 = vld [vmem:[#allocation5 + $0x40c] sm:$0xf0]  ;;  %v2415_v58 = vld [vmem:[#allocation5 + $0x68] sm:$0xf] }
  0x58   :  { %1987 = vmatpush.bf16.msra.mxu3 %v3492_v31  ;;  %v2769_v31 = vld [vmem:[#allocation5 + $0x348] sm:$0xf0]  ;;  %v2896_v15 = vor.u32 %v3645_v10, %v2895_v9  ;;  %v2439_v46 = vld [vmem:[#allocation5 + $0x98] sm:$0xf]  ;;  %v3531_v47 = vld [vmem:[#allocation5 + $0xac] sm:$0xf0] }
  0x59   :  { %1949 = vmatpush.bf16.msra.mxu0 %v2892_v39  ;;  %v3755_v39 = vld [vmem:[#allocation5 + $0x7b4] sm:$0xf]  ;;  %v2631_v48 = vld [vmem:[#allocation5 + $0x218] sm:$0xf]  ;;  %v3579_v50 = vld [vmem:[#allocation5 + $0x22c] sm:$0xf0] }
  0x5a   :  { %1962 = vmatpush.bf16.msra.mxu1 %v3084_v40  ;;  %v3345_v40 = vld [vmem:[#allocation5 + $0x7c8] sm:$0xf0]  ;;  %v3525_v59 = vld [vmem:[#allocation5 + $0x7c] sm:$0xf0]  ;;  %v2391_v6 = vld [vmem:[#allocation5 + $0x38] sm:$0xf] }
  0x5b   :  { %1975 = vmatpush.bf16.msra.mxu2 %v3276_v41  ;;  %v2772_v41 = vor.u32 %v3611_v30, %v2769_v31  ;;  %v3348_v49 = vor.u32 %v3755_v39, %v3345_v40  ;;  %v2680_v30 = vor.u32 %v3591_v24, %v2679_v21  ;;  %v2872_v31 = vor.u32 %v3639_v26, %v2871_v25  ;;  %v2847_v39 = vld [vmem:[#allocation5 + $0x3c8] sm:$0xf]  ;;  %v3633_v40 = vld [vmem:[#allocation5 + $0x3dc] sm:$0xf0]  ;;  %v2583_v8 = vld [vmem:[#allocation5 + $0x1b8] sm:$0xf] }
  0x5c   :  { %1988 = vmatpush.bf16.msra.mxu3 %v3468_v45  ;;  %v3156_v45 = vor.u32 %v3707_v36, %v3153_v37  ;;  %v3585_v37 = vld [vmem:[#allocation5 + $0x25c] sm:$0xf0]  ;;  %v3567_v10 = vld [vmem:[#allocation5 + $0x1cc] sm:$0xf0]  ;;  %v2559_v24 = vld [vmem:[#allocation5 + $0x188] sm:$0xf] }
  0x5d   :  { %1950 = vmatpush.bf16.msra.mxu0 %v2868_v51  ;;  %v3749_v51 = vld [vmem:[#allocation5 + $0x784] sm:$0xf]  ;;  %v2584_v21 = vor.u32 %v3567_v10, %v2583_v8  ;;  %v3561_v25 = vld [vmem:[#allocation5 + $0x19c] sm:$0xf0]  ;;  %v2751_v26 = vld [vmem:[#allocation5 + $0x308] sm:$0xf] }
  0x5e   :  { %1963 = vmatpush.bf16.msra.mxu1 %v3060_v52  ;;  %v3321_v52 = vld [vmem:[#allocation5 + $0x798] sm:$0xf0]  ;;  %v3231_v8 = vld [vmem:[#allocation5 + $0x6c8] sm:$0xf] }
  0x5f   :  { %1976 = vmatpush.bf16.msra.mxu2 %v3252_v53  ;;  %v2535_v53 = vld [vmem:[#allocation5 + $0x158] sm:$0xf]  ;;  %v3423_v10 = vld [vmem:[#allocation5 + $0x848] sm:$0xf] }
  0x60   :  { %1989 = vmatpush.bf16.msra.mxu3 %v3444_v57  ;;  %v3603_v57 = vld [vmem:[#allocation5 + $0x2ec] sm:$0xf0] }
  0x61   :  { %1951 = vmatpush.bf16.msra.mxu0 %v2844_v63  ;;  %v3699_v63 = vld [vmem:[#allocation5 + $0x5ec] sm:$0xf0]  ;;  %v2728_v2 = vor.u32 %v3603_v57, %v2727_v55  ;;  %v2440_v55 = vor.u32 %v3531_v47, %v2439_v46 }
  0x62   :  { %1964 = vmatpush.bf16.msra.mxu1 %v3036_v0  ;;  %v3324_v0 = vor.u32 %v3749_v51, %v3321_v52  ;;  %v3112_v7 = vor.u32 %v3699_v63, %v3111_v62  ;;  %v2823_v51 = vld [vmem:[#allocation5 + $0x398] sm:$0xf]  ;;  %v3627_v52 = vld [vmem:[#allocation5 + $0x3ac] sm:$0xf0]  ;;  %v3573_v62 = vld [vmem:[#allocation5 + $0x1fc] sm:$0xf0] }
  0x63   :  { %1977 = vmatpush.bf16.msra.mxu2 %v3228_v1  ;;  %v2536_v1 = vor.u32 %v3555_v54, %v2535_v53  ;;  %v3015_v53 = vld [vmem:[#allocation5 + $0x518] sm:$0xf]  ;;  %v3675_v54 = vld [vmem:[#allocation5 + $0x52c] sm:$0xf0]  ;;  %v2824_v57 = vor.u32 %v3627_v52, %v2823_v51  ;;  %v2799_v63 = vld [vmem:[#allocation5 + $0x368] sm:$0xf] }
  0x64   :  { %1990 = vmatpush.bf16.msra.mxu3 %v3420_v5  ;;  %v3549_v5 = vld [vmem:[#allocation5 + $0x13c] sm:$0xf0] }
  0x65   :  { %1952 = vmatpush.bf16.msra.mxu0 %v2820_v11  ;;  %v3087_v11 = vld [vmem:[#allocation5 + $0x5a8] sm:$0xf]  ;;  %v3789_v52 = vld [vmem:[#allocation5 + $0x8bc] sm:$0xf0] }
  0x66   :  { %1965 = vmatpush.bf16.msra.mxu1 %v3012_v12  ;;  %v3693_v12 = vld [vmem:[#allocation5 + $0x5bc] sm:$0xf0] }
  0x67   :  { %1978 = vmatpush.bf16.msra.mxu2 %v3204_v13  ;;  %v2512_v13 = vor.u32 %v3549_v5, %v2511_v4  ;;  %v3088_v23 = vor.u32 %v3693_v12, %v3087_v11  ;;  %v2775_v11 = vld [vmem:[#allocation5 + $0x338] sm:$0xf]  ;;  %v3615_v12 = vld [vmem:[#allocation5 + $0x34c] sm:$0xf0] }
  0x68   :  { %1991 = vmatpush.bf16.msra.mxu3 %v3396_v17  ;;  %v3543_v17 = vld [vmem:[#allocation5 + $0x10c] sm:$0xf0] }
  0x69   :  { %1953 = vmatpush.bf16.msra.mxu0 %v2796_v27  ;;  %v3063_v27 = vld [vmem:[#allocation5 + $0x578] sm:$0xf] }
  0x6a   :  { %1966 = vmatpush.bf16.msra.mxu1 %v2988_v28  ;;  %v3687_v28 = vld [vmem:[#allocation5 + $0x58c] sm:$0xf0] }
  0x6b   :  { %1979 = vmatpush.bf16.msra.mxu2 %v3180_v29  ;;  %v2488_v29 = vor.u32 %v3543_v17, %v2487_v16  ;;  %v3064_v36 = vor.u32 %v3687_v28, %v3063_v27  ;;  %v2367_v16 = vld [vmem:[#allocation5 + $0x8] sm:$0xf]  ;;  %v3513_v17 = vld [vmem:[#allocation5 + $0x1c] sm:$0xf0] }
  0x6c   :  { %1992 = vmatpush.bf16.msra.mxu3 %v3372_v33  ;;  %v3537_v33 = vld [vmem:[#allocation5 + $0xdc] sm:$0xf0] }
  0x6d   :  { %1954 = vmatpush.bf16.msra.mxu0 %v2772_v41  ;;  %v3039_v41 = vld [vmem:[#allocation5 + $0x548] sm:$0xf]  ;;  %v2464_v43 = vor.u32 %v3537_v33, %v2463_v32  ;;  %v3609_v28 = vld [vmem:[#allocation5 + $0x31c] sm:$0xf0]  ;;  %v3747_v32 = vld [vmem:[#allocation5 + $0x76c] sm:$0xf0] }
  0x6e   :  { %1967 = vmatpush.bf16.msra.mxu1 %v2964_v44  ;;  %v2656_v44 = vor.u32 %v3585_v37, %v2655_v34  ;;  %v3495_v33 = vld [vmem:[#allocation5 + $0x8d8] sm:$0xf]  ;;  %v2368_v34 = vor.u32 %v3513_v17, %v2367_v16  ;;  %v3552_v37 = vld [vmem:[#allocation5 + $0x15c] sm:$0xf]  ;;  %v2657_v16 = vld [vmem:[#allocation5 + $0x260] sm:$0xf0] }
  0x6f   :  { %1980 = vmatpush.bf16.msra.mxu2 %v3156_v45  ;;  %v2848_v45 = vor.u32 %v3633_v40, %v2847_v39  ;;  %v2537_v39 = vld [vmem:[#allocation5 + $0x170] sm:$0xf0]  ;;  %v2560_v40 = vor.u32 %v3561_v25, %v2559_v24  ;;  %v3207_v24 = vld [vmem:[#allocation5 + $0x698] sm:$0xf]  ;;  %v3723_v25 = vld [vmem:[#allocation5 + $0x6ac] sm:$0xf0] }
  0x70   :  { %1993 = vmatpush.bf16.msra.mxu3 %v3348_v49  ;;  %v3040_v49 = vor.u32 %v3681_v42, %v3039_v41  ;;  %v2752_v41 = vor.u32 %v3609_v28, %v2751_v26  ;;  %v3600_v42 = vld [vmem:[#allocation5 + $0x2dc] sm:$0xf]  ;;  %v2540_v47 = vor.u32 %v3552_v37, %v2537_v39  ;;  %v3399_v26 = vld [vmem:[#allocation5 + $0x818] sm:$0xf]  ;;  %v3771_v28 = vld [vmem:[#allocation5 + $0x82c] sm:$0xf0] }
  0x71   :  { %1955 = vmatpush.bf16.msra.mxu0 %v2748_v56  ;;  %v2632_v56 = vor.u32 %v3579_v50, %v2631_v48  ;;  %v3279_v48 = vld [vmem:[#allocation5 + $0x728] sm:$0xf]  ;;  %v3717_v39 = vld [vmem:[#allocation5 + $0x67c] sm:$0xf0] }
  0x72   :  { %1968 = vmatpush.bf16.msra.mxu1 %v2940_v60  ;;  %v2607_v60 = vld [vmem:[#allocation5 + $0x1e8] sm:$0xf] }
  0x73   :  { %1981 = vmatpush.bf16.msra.mxu2 %v3132_v61  ;;  %v3016_v61 = vor.u32 %v3675_v54, %v3015_v53  ;;  %v2608_v4 = vor.u32 %v3573_v62, %v2607_v60  ;;  %v3471_v50 = vld [vmem:[#allocation5 + $0x8a8] sm:$0xf]  ;;  %v3546_v53 = vld [vmem:[#allocation5 + $0x12c] sm:$0xf]  ;;  %v2513_v54 = vld [vmem:[#allocation5 + $0x140] sm:$0xf0] }
  0x74   :  { %1994 = vmatpush.bf16.msra.mxu3 %v3324_v0  ;;  %1956 = vmatmul.bf16.vlgmr.msra.gmra.mxu0 %v3954_v18  ;;  %v3621_v0 = vld [vmem:[#allocation5 + $0x37c] sm:$0xf0]  ;;  %v3255_v60 = vld [vmem:[#allocation5 + $0x6f8] sm:$0xf]  ;;  %v3183_v37 = vld [vmem:[#allocation5 + $0x668] sm:$0xf] }
  0x75   :  { %2000 = vmatpush.bf16.msrb.mxu0 %v2536_v1  ;;  %1969 = vmatmul.bf16.vlgmr.msra.gmra.mxu1 %v3958_v20  ;;  %v2991_v1 = vld [vmem:[#allocation5 + $0x4e8] sm:$0xf]  ;;  %v2800_v5 = vor.u32 %v3621_v0, %v2799_v63  ;;  %v3447_v62 = vld [vmem:[#allocation5 + $0x878] sm:$0xf]  ;;  %v3783_v0 = vld [vmem:[#allocation5 + $0x88c] sm:$0xf0] }
  0x76   :  { %2013 = vmatpush.bf16.msrb.mxu1 %v2728_v2  ;;  %1982 = vmatmul.bf16.vlgmr.msra.gmra.mxu2 %v3966_v35  ;;  %v3669_v2 = vld [vmem:[#allocation5 + $0x4fc] sm:$0xf0] }
  0x77   :  { %2026 = vmatpush.bf16.msrb.mxu2 %v2920_v3  ;;  %1995 = vmatmul.bf16.vlgmr.msra.gmra.mxu3 %v3968_v38  ;;  %v2416_v3 = vor.u32 %v3525_v59, %v2415_v58  ;;  %v2992_v9 = vor.u32 %v3669_v2, %v2991_v1  ;;  %v3472_v58 = vor.u32 %v3789_v52, %v3471_v50  ;;  %v3540_v1 = vld [vmem:[#allocation5 + $0xfc] sm:$0xf]  ;;  %v2489_v2 = vld [vmem:[#allocation5 + $0x110] sm:$0xf0]  ;;  %v3159_v50 = vld [vmem:[#allocation5 + $0x638] sm:$0xf] }
  0x78   :  { %2039 = vmatpush.bf16.msrb.mxu3 %v3112_v7  ;;  %v3519_v7 = vld [vmem:[#allocation5 + $0x4c] sm:$0xf0]  ;;  %v2516_v59 = vor.u32 %v3546_v53, %v2513_v54  ;;  %v3351_v52 = vld [vmem:[#allocation5 + $0x7b8] sm:$0xf] }
  0x79   :  { %2001 = vmatpush.bf16.msrb.mxu0 %v2512_v13  ;;  %v2967_v13 = vld [vmem:[#allocation5 + $0x4b8] sm:$0xf]  ;;  %v3759_v54 = vld [vmem:[#allocation5 + $0x7cc] sm:$0xf0] }
  0x7a   :  { %2014 = vmatpush.bf16.msrb.mxu1 %v2704_v14  ;;  %v3663_v14 = vld [vmem:[#allocation5 + $0x4cc] sm:$0xf0] }
  0x7b   :  { %2027 = vmatpush.bf16.msrb.mxu2 %v2896_v15  ;;  %v2392_v15 = vor.u32 %v3519_v7, %v2391_v6  ;;  %v2968_v27 = vor.u32 %v3663_v14, %v2967_v13  ;;  %v3448_v6 = vor.u32 %v3783_v0, %v3447_v62  ;;  %v2492_v7 = vor.u32 %v3540_v1, %v2489_v2  ;;  %v3534_v13 = vld [vmem:[#allocation5 + $0xcc] sm:$0xf]  ;;  %v2465_v14 = vld [vmem:[#allocation5 + $0xe0] sm:$0xf0]  ;;  %v3327_v0 = vld [vmem:[#allocation5 + $0x788] sm:$0xf] }
  0x7c   :  { %2040 = vmatpush.bf16.msrb.mxu3 %v3088_v23  ;;  %v2776_v23 = vor.u32 %v3615_v12, %v2775_v11  ;;  %v3777_v12 = vld [vmem:[#allocation5 + $0x85c] sm:$0xf0]  ;;  %v3352_v62 = vor.u32 %v3759_v54, %v3351_v52  ;;  %v3510_v2 = vld [vmem:[#allocation5 + $0xc] sm:$0xf] }
  0x7d   :  { %2002 = vmatpush.bf16.msrb.mxu0 %v2488_v29  ;;  %v2943_v29 = vld [vmem:[#allocation5 + $0x488] sm:$0xf]  ;;  %v3753_v1 = vld [vmem:[#allocation5 + $0x79c] sm:$0xf0]  ;;  %v3630_v52 = vld [vmem:[#allocation5 + $0x3cc] sm:$0xf] }
  0x7e   :  { %2015 = vmatpush.bf16.msrb.mxu1 %v2680_v30  ;;  %v3657_v30 = vld [vmem:[#allocation5 + $0x49c] sm:$0xf0]  ;;  %v3678_v54 = vld [vmem:[#allocation5 + $0x54c] sm:$0xf] }
  0x7f   :  { %2028 = vmatpush.bf16.msrb.mxu2 %v2872_v31  ;;  %v3303_v31 = vld [vmem:[#allocation5 + $0x758] sm:$0xf] }
  0x80   :  { %2041 = vmatpush.bf16.msrb.mxu3 %v3064_v36  ;;  %v3795_v36 = vld [vmem:[#allocation5 + $0x8ec] sm:$0xf0] }
  0x81   :  { %2003 = vmatpush.bf16.msrb.mxu0 %v2464_v43  ;;  %v2729_v43 = vld [vmem:[#allocation5 + $0x2f0] sm:$0xf0]  ;;  %v3496_v46 = vor.u32 %v3795_v36, %v3495_v33  ;;  %v3208_v33 = vor.u32 %v3723_v25, %v3207_v24 }
  0x82   :  { %2016 = vmatpush.bf16.msrb.mxu1 %v2656_v44  ;;  %v2944_v44 = vor.u32 %v3657_v30, %v2943_v29  ;;  %v2732_v51 = vor.u32 %v3600_v42, %v2729_v43  ;;  %v3528_v29 = vld [vmem:[#allocation5 + $0x9c] sm:$0xf]  ;;  %v2441_v30 = vld [vmem:[#allocation5 + $0xb0] sm:$0xf0]  ;;  %v3765_v42 = vld [vmem:[#allocation5 + $0x7fc] sm:$0xf0] }
  0x83   :  { %2029 = vmatpush.bf16.msrb.mxu2 %v2848_v45  ;;  %v3304_v45 = vor.u32 %v3747_v32, %v3303_v31  ;;  %v3576_v31 = vld [vmem:[#allocation5 + $0x21c] sm:$0xf]  ;;  %v2633_v32 = vld [vmem:[#allocation5 + $0x230] sm:$0xf0]  ;;  %v2444_v36 = vor.u32 %v3528_v29, %v2441_v30  ;;  %v3522_v43 = vld [vmem:[#allocation5 + $0x6c] sm:$0xf] }
  0x84   :  { %2042 = vmatpush.bf16.msrb.mxu3 %v3040_v49  ;;  %v3741_v49 = vld [vmem:[#allocation5 + $0x73c] sm:$0xf0]  ;;  %v3089_v30 = vld [vmem:[#allocation5 + $0x5c0] sm:$0xf0] }
  0x85   :  { %2004 = vmatpush.bf16.msrb.mxu0 %v2440_v55  ;;  %v3594_v55 = vld [vmem:[#allocation5 + $0x2ac] sm:$0xf] }
  0x86   :  { %2017 = vmatpush.bf16.msrb.mxu1 %v2632_v56  ;;  %v2705_v56 = vld [vmem:[#allocation5 + $0x2c0] sm:$0xf0] }
  0x87   :  { %2030 = vmatpush.bf16.msrb.mxu2 %v2824_v57  ;;  %v3280_v57 = vor.u32 %v3741_v49, %v3279_v48  ;;  %v2708_v63 = vor.u32 %v3594_v55, %v2705_v56  ;;  %v3516_v55 = vld [vmem:[#allocation5 + $0x3c] sm:$0xf]  ;;  %v2393_v56 = vld [vmem:[#allocation5 + $0x50] sm:$0xf0] }
  0x88   :  { %2043 = vmatpush.bf16.msrb.mxu3 %v3016_v61  ;;  %v3735_v61 = vld [vmem:[#allocation5 + $0x70c] sm:$0xf0] }
  0x89   :  { %2005 = vmatpush.bf16.msrb.mxu0 %v2416_v3  ;;  %v3588_v3 = vld [vmem:[#allocation5 + $0x27c] sm:$0xf] }
  0x8a   :  { %2018 = vmatpush.bf16.msrb.mxu1 %v2608_v4  ;;  %v2681_v4 = vld [vmem:[#allocation5 + $0x290] sm:$0xf0] }
  0x8b   :  { %2031 = vmatpush.bf16.msrb.mxu2 %v2800_v5  ;;  %v3256_v5 = vor.u32 %v3735_v61, %v3255_v60  ;;  %v2684_v11 = vor.u32 %v3588_v3, %v2681_v4  ;;  %v3135_v60 = vld [vmem:[#allocation5 + $0x608] sm:$0xf]  ;;  %v3705_v61 = vld [vmem:[#allocation5 + $0x61c] sm:$0xf0]  ;;  %v2369_v4 = vld [vmem:[#allocation5 + $0x20] sm:$0xf0] }
  0x8c   :  { %2044 = vmatpush.bf16.msrb.mxu3 %v2992_v9  ;;  %v3729_v9 = vld [vmem:[#allocation5 + $0x6dc] sm:$0xf0] }
  0x8d   :  { %2006 = vmatpush.bf16.msrb.mxu0 %v2392_v15  ;;  %v3582_v15 = vld [vmem:[#allocation5 + $0x24c] sm:$0xf]  ;;  %v3232_v17 = vor.u32 %v3729_v9, %v3231_v8  ;;  %v2921_v8 = vld [vmem:[#allocation5 + $0x470] sm:$0xf0]  ;;  %v3696_v9 = vld [vmem:[#allocation5 + $0x5dc] sm:$0xf] }
  0x8e   :  { %2019 = vmatpush.bf16.msrb.mxu1 %v2584_v21  ;;  %v3424_v21 = vor.u32 %v3777_v12, %v3423_v10  ;;  %v3136_v10 = vor.u32 %v3705_v61, %v3135_v60  ;;  %v3744_v12 = vld [vmem:[#allocation5 + $0x75c] sm:$0xf]  ;;  %v3425_v60 = vld [vmem:[#allocation5 + $0x860] sm:$0xf0] }
  0x8f   :  { %2032 = vmatpush.bf16.msrb.mxu2 %v2776_v23  ;;  %v2468_v23 = vor.u32 %v3534_v13, %v2465_v14  ;;  %v3305_v13 = vld [vmem:[#allocation5 + $0x770] sm:$0xf0]  ;;  %v3328_v14 = vor.u32 %v3753_v1, %v3327_v0 }
  0x90   :  { %2045 = vmatpush.bf16.msrb.mxu3 %v2968_v27  ;;  %v2660_v27 = vor.u32 %v3582_v15, %v2657_v16  ;;  %v2372_v15 = vor.u32 %v3510_v2, %v2369_v4  ;;  %v3792_v16 = vld [vmem:[#allocation5 + $0x8dc] sm:$0xf]  ;;  %v3308_v25 = vor.u32 %v3744_v12, %v3305_v13  ;;  %v2825_v1 = vld [vmem:[#allocation5 + $0x3b0] sm:$0xf0] }
  0x91   :  { %2007 = vmatpush.bf16.msrb.mxu0 %v2368_v34  ;;  %v3400_v34 = vor.u32 %v3771_v28, %v3399_v26  ;;  %v3642_v26 = vld [vmem:[#allocation5 + $0x42c] sm:$0xf]  ;;  %v3672_v2 = vld [vmem:[#allocation5 + $0x51c] sm:$0xf] }
  0x92   :  { %2020 = vmatpush.bf16.msrb.mxu1 %v2560_v40  ;;  %v3375_v40 = vld [vmem:[#allocation5 + $0x7e8] sm:$0xf]  ;;  %v3690_v28 = vld [vmem:[#allocation5 + $0x5ac] sm:$0xf] }
  0x93   :  { %2033 = vmatpush.bf16.msrb.mxu2 %v2752_v41  ;;  %v2636_v41 = vor.u32 %v3576_v31, %v2633_v32  ;;  %v3376_v48 = vor.u32 %v3765_v42, %v3375_v40  ;;  %v3738_v31 = vld [vmem:[#allocation5 + $0x72c] sm:$0xf]  ;;  %v3281_v32 = vld [vmem:[#allocation5 + $0x740] sm:$0xf0]  ;;  %v3636_v40 = vld [vmem:[#allocation5 + $0x3fc] sm:$0xf] }
  0x94   :  { %2046 = vmatpush.bf16.msrb.mxu3 %v2944_v44  ;;  %2008 = vmatmul.bf16.vlgmr.msrb.gmra.mxu0 %v3956_v19  ;;  %v2417_v44 = vld [vmem:[#allocation5 + $0x80] sm:$0xf0]  ;;  %v3684_v42 = vld [vmem:[#allocation5 + $0x57c] sm:$0xf] }
  0x95   :  { %2052 = vmatpush.bf16.msra.mxu0 %v3304_v45  ;;  %2021 = vmatmul.bf16.vlgmr.msrb.gmra.mxu1 %v3960_v22  ;;  %v3570_v45 = vld [vmem:[#allocation5 + $0x1ec] sm:$0xf]  ;;  %v2420_v49 = vor.u32 %v3522_v43, %v2417_v44  ;;  %v3065_v44 = vld [vmem:[#allocation5 + $0x590] sm:$0xf0] }
  0x96   :  { %2065 = vmatpush.bf16.msra.mxu1 %v3496_v46  ;;  %2034 = vmatmul.bf16.vlgmr.msrb.gmra.mxu2 %v3954_v18  ;;  %v2609_v46 = vld [vmem:[#allocation5 + $0x200] sm:$0xf0] }
  0x97   :  { %2078 = vmatpush.bf16.msra.mxu2 %v2540_v47  ;;  %2047 = vmatmul.bf16.vlgmr.msrb.gmra.mxu3 %v3958_v20  ;;  %v3184_v47 = vor.u32 %v3717_v39, %v3183_v37  ;;  %v2612_v53 = vor.u32 %v3570_v45, %v2609_v46  ;;  %v3092_v37 = vor.u32 %v3690_v28, %v3089_v30  ;;  %v3732_v45 = vld [vmem:[#allocation5 + $0x6fc] sm:$0xf]  ;;  %v3257_v46 = vld [vmem:[#allocation5 + $0x710] sm:$0xf0] }
  0x98   :  { %2091 = vmatpush.bf16.msra.mxu3 %v2732_v51  ;;  %v3711_v51 = vld [vmem:[#allocation5 + $0x64c] sm:$0xf0]  ;;  %v3284_v39 = vor.u32 %v3738_v31, %v3281_v32  ;;  %v3612_v31 = vld [vmem:[#allocation5 + $0x33c] sm:$0xf]  ;;  %v2777_v32 = vld [vmem:[#allocation5 + $0x350] sm:$0xf0] }
  0x99   :  { %2053 = vmatpush.bf16.msra.mxu0 %v3280_v57  ;;  %v3564_v57 = vld [vmem:[#allocation5 + $0x1bc] sm:$0xf] }
  0x9a   :  { %2066 = vmatpush.bf16.msra.mxu1 %v3472_v58  ;;  %v2585_v58 = vld [vmem:[#allocation5 + $0x1d0] sm:$0xf0] }
  0x9b   :  { %2079 = vmatpush.bf16.msra.mxu2 %v2516_v59  ;;  %v3160_v59 = vor.u32 %v3711_v51, %v3159_v50  ;;  %v2588_v3 = vor.u32 %v3564_v57, %v2585_v58  ;;  %v3068_v50 = vor.u32 %v3684_v42, %v3065_v44  ;;  %v3260_v51 = vor.u32 %v3732_v45, %v3257_v46  ;;  %v3726_v57 = vld [vmem:[#allocation5 + $0x6cc] sm:$0xf]  ;;  %v3233_v58 = vld [vmem:[#allocation5 + $0x6e0] sm:$0xf0]  ;;  %v3756_v42 = vld [vmem:[#allocation5 + $0x7bc] sm:$0xf] }
  0x9c   :  { %2092 = vmatpush.bf16.msra.mxu3 %v2708_v63  ;;  %v2396_v63 = vor.u32 %v3516_v55, %v2393_v56  ;;  %v3041_v56 = vld [vmem:[#allocation5 + $0x560] sm:$0xf0]  ;;  %v3236_v0 = vor.u32 %v3726_v57, %v3233_v58  ;;  %v2780_v45 = vor.u32 %v3612_v31, %v2777_v32  ;;  %v3606_v46 = vld [vmem:[#allocation5 + $0x30c] sm:$0xf] }
  0x9d   :  { %2054 = vmatpush.bf16.msra.mxu0 %v3256_v5  ;;  %v3558_v5 = vld [vmem:[#allocation5 + $0x18c] sm:$0xf]  ;;  %v3329_v57 = vld [vmem:[#allocation5 + $0x7a0] sm:$0xf0] }
  0x9e   :  { %2067 = vmatpush.bf16.msra.mxu1 %v3448_v6  ;;  %v2561_v6 = vld [vmem:[#allocation5 + $0x1a0] sm:$0xf0] }
  0x9f   :  { %2080 = vmatpush.bf16.msra.mxu2 %v2492_v7  ;;  %v3648_v7 = vld [vmem:[#allocation5 + $0x45c] sm:$0xf] }
  0xa0   :  { %2093 = vmatpush.bf16.msra.mxu3 %v2684_v11  ;;  %v3113_v11 = vld [vmem:[#allocation5 + $0x5f0] sm:$0xf0] }
  0xa1   :  { %2055 = vmatpush.bf16.msra.mxu0 %v3232_v17  ;;  %v3497_v17 = vld [vmem:[#allocation5 + $0x8f0] sm:$0xf0]  ;;  %v3116_v24 = vor.u32 %v3696_v9, %v3113_v11  ;;  %v3618_v11 = vld [vmem:[#allocation5 + $0x36c] sm:$0xf] }
  0xa2   :  { %2068 = vmatpush.bf16.msra.mxu1 %v3424_v21  ;;  %v2564_v21 = vor.u32 %v3558_v5, %v2561_v6  ;;  %v3500_v29 = vor.u32 %v3792_v16, %v3497_v17  ;;  %v3720_v5 = vld [vmem:[#allocation5 + $0x69c] sm:$0xf]  ;;  %v3209_v6 = vld [vmem:[#allocation5 + $0x6b0] sm:$0xf0] }
  0xa3   :  { %2081 = vmatpush.bf16.msra.mxu2 %v2468_v23  ;;  %v2924_v23 = vor.u32 %v3648_v7, %v2921_v8  ;;  %v3986_v7 = vld [vmem:[#allocation7] sm:$0x3f]  ;;  %v3768_v8 = vld [vmem:[#allocation5 + $0x81c] sm:$0xf]  ;;  %v3401_v9 = vld [vmem:[#allocation5 + $0x830] sm:$0xf0]  ;;  %v3212_v13 = vor.u32 %v3720_v5, %v3209_v6 }
  0xa4   :  { %2094 = vmatpush.bf16.msra.mxu3 %v2660_v27  ;;  %v2897_v27 = vld [vmem:[#allocation5 + $0x440] sm:$0xf0]  ;;  %v371_v16 = vperm.slane %v3986_v7, 0  ;;  %v3404_v17 = vor.u32 %v3768_v8, %v3401_v9  ;;  %v3119_v8 = vld [vmem:[#allocation5 + $0x5e0] sm:$0xf] }
  0xa5   :  { %2056 = vmatpush.bf16.msra.mxu0 %v3208_v33  ;;  %v3786_v33 = vld [vmem:[#allocation5 + $0x8ac] sm:$0xf]  ;;  %v3700_v9 = vld [vmem:[#allocation5 + $0x5f4] sm:$0xf0] }
  0xa6   :  { %2069 = vmatpush.bf16.msra.mxu1 %v3400_v34  ;;  %v3473_v34 = vld [vmem:[#allocation5 + $0x8c0] sm:$0xf0] }
  0xa7   :  { %2082 = vmatpush.bf16.msra.mxu2 %v2444_v36  ;;  %v2900_v36 = vor.u32 %v3642_v26, %v2897_v27  ;;  %v3476_v43 = vor.u32 %v3786_v33, %v3473_v34  ;;  %v3377_v26 = vld [vmem:[#allocation5 + $0x800] sm:$0xf0]  ;;  %v3660_v33 = vld [vmem:[#allocation5 + $0x4bc] sm:$0xf] }
  0xa8   :  { %2095 = vmatpush.bf16.msra.mxu3 %v2636_v41  ;;  %v2873_v41 = vld [vmem:[#allocation5 + $0x410] sm:$0xf0] }
  0xa9   :  { %2057 = vmatpush.bf16.msra.mxu0 %v3184_v47  ;;  %v3780_v47 = vld [vmem:[#allocation5 + $0x87c] sm:$0xf] }
  0xaa   :  { %2070 = vmatpush.bf16.msra.mxu1 %v3376_v48  ;;  %v3449_v48 = vld [vmem:[#allocation5 + $0x890] sm:$0xf0] }
  0xab   :  { %2083 = vmatpush.bf16.msra.mxu2 %v2420_v49  ;;  %v2876_v49 = vor.u32 %v3636_v40, %v2873_v41  ;;  %v3452_v55 = vor.u32 %v3780_v47, %v3449_v48  ;;  %v3708_v40 = vld [vmem:[#allocation5 + $0x63c] sm:$0xf]  ;;  %v3161_v41 = vld [vmem:[#allocation5 + $0x650] sm:$0xf0]  ;;  %v2753_v47 = vld [vmem:[#allocation5 + $0x320] sm:$0xf0] }
  0xac   :  { %2096 = vmatpush.bf16.msra.mxu3 %v2612_v53  ;;  %v2849_v53 = vld [vmem:[#allocation5 + $0x3e0] sm:$0xf0] }
  0xad   :  { %2058 = vmatpush.bf16.msra.mxu0 %v3160_v59  ;;  %v3774_v59 = vld [vmem:[#allocation5 + $0x84c] sm:$0xf]  ;;  %v2852_v61 = vor.u32 %v3630_v52, %v2849_v53 }
  0xae   :  { %2071 = vmatpush.bf16.msra.mxu1 %v3352_v62  ;;  %v3624_v62 = vld [vmem:[#allocation5 + $0x39c] sm:$0xf]  ;;  %v3428_v4 = vor.u32 %v3774_v59, %v3425_v60  ;;  %v3702_v52 = vld [vmem:[#allocation5 + $0x60c] sm:$0xf]  ;;  %v2543_v60 = vld [vmem:[#allocation5 + $0x160] sm:$0xf] }
  0xaf   :  { %2084 = vmatpush.bf16.msra.mxu2 %v2396_v63  ;;  %v3044_v63 = vor.u32 %v3678_v54, %v3041_v56  ;;  %v3750_v56 = vld [vmem:[#allocation5 + $0x78c] sm:$0xf] }
  0xb0   :  { %2097 = vmatpush.bf16.msra.mxu3 %v2588_v3  ;;  %v3017_v3 = vld [vmem:[#allocation5 + $0x530] sm:$0xf0] }
  0xb1   :  { %2059 = vmatpush.bf16.msra.mxu0 %v3136_v10  ;;  %v2828_v10 = vor.u32 %v3624_v62, %v2825_v1  ;;  %v3020_v12 = vor.u32 %v3672_v2, %v3017_v3  ;;  %v2735_v62 = vld [vmem:[#allocation5 + $0x2e0] sm:$0xf]  ;;  %v3652_v2 = vld [vmem:[#allocation5 + $0x474] sm:$0xf0] }
  0xb2   :  { %2072 = vmatpush.bf16.msra.mxu1 %v3328_v14  ;;  %v2801_v14 = vld [vmem:[#allocation5 + $0x380] sm:$0xf0]  ;;  %v2927_v1 = vld [vmem:[#allocation5 + $0x460] sm:$0xf] }
  0xb3   :  { %2085 = vmatpush.bf16.msra.mxu2 %v2372_v15  ;;  %v3666_v15 = vld [vmem:[#allocation5 + $0x4ec] sm:$0xf]  ;;  %v2804_v27 = vor.u32 %v3618_v11, %v2801_v14  ;;  %v3332_v11 = vor.u32 %v3750_v56, %v3329_v57  ;;  %v2928_v14 = vor.u32 %v3652_v2, %v2927_v1  ;;  %v3580_v2 = vld [vmem:[#allocation5 + $0x234] sm:$0xf0] }
  0xb4   :  { %2098 = vmatpush.bf16.msra.mxu3 %v2564_v21  ;;  %2060 = vmatmul.bf16.vlgmr.msra.gmra.mxu0 %v3966_v35  ;;  %v2993_v21 = vld [vmem:[#allocation5 + $0x500] sm:$0xf0]  ;;  %v1853_v28 = vpop.f32.mrf.mxu0 }
  0xb5   :  { %2104 = vmatpush.bf16.msrb.mxu0 %v2924_v23  ;;  %2073 = vmatmul.bf16.vlgmr.msra.gmra.mxu1 %v3968_v38  ;;  %v3714_v23 = vld [vmem:[#allocation5 + $0x66c] sm:$0xf]  ;;  %v1854_v34 = vadd.f32 %v1853_v28, %v371_v16  ;;  %v3550_v16 = vld [vmem:[#allocation5 + $0x144] sm:$0xf0] }
  0xb6   :  { %2117 = vmatpush.bf16.msrb.mxu1 %v3116_v24  ;;  %2086 = vmatmul.bf16.vlgmr.msra.gmra.mxu2 %v3956_v19  ;;  %v3185_v24 = vld [vmem:[#allocation5 + $0x680] sm:$0xf0] }
  0xb7   :  { %2130 = vmatpush.bf16.msrb.mxu2 %v3308_v25  ;;  %2099 = vmatmul.bf16.vlgmr.msra.gmra.mxu3 %v3960_v22  ;;  %v3762_v25 = vld [vmem:[#allocation5 + $0x7ec] sm:$0xf]  ;;  %v3188_v30 = vor.u32 %v3714_v23, %v3185_v24  ;;  %v3598_v23 = vld [vmem:[#allocation5 + $0x2c4] sm:$0xf0]  ;;  %v2903_v24 = vld [vmem:[#allocation5 + $0x430] sm:$0xf] }
  0xb8   :  { %2143 = vmatpush.bf16.msrb.mxu3 %v3500_v29  ;;  %v2996_v29 = vor.u32 %v3666_v15, %v2993_v21  ;;  %v2519_v15 = vld [vmem:[#allocation5 + $0x130] sm:$0xf]  ;;  %v3120_v21 = vor.u32 %v3700_v9, %v3119_v8  ;;  %v3023_v8 = vld [vmem:[#allocation5 + $0x520] sm:$0xf]  ;;  %v3676_v9 = vld [vmem:[#allocation5 + $0x534] sm:$0xf0] }
  0xb9   :  { %2105 = vmatpush.bf16.msrb.mxu0 %v2900_v36  ;;  %v1866_v36 = vpop.f32.mrf.mxu1  ;;  %v1879_v53 = vpop.f32.mrf.mxu2 }
  0xba   :  { %2118 = vmatpush.bf16.msrb.mxu1 %v3092_v37  ;;  %v3380_v37 = vor.u32 %v3762_v25, %v3377_v26  ;;  %v1867_v44 = vadd.f32 %v1866_v36, %v1854_v34  ;;  %v3646_v25 = vld [vmem:[#allocation5 + $0x444] sm:$0xf0]  ;;  %v3095_v26 = vld [vmem:[#allocation5 + $0x5b0] sm:$0xf]  ;;  %v3544_v34 = vld [vmem:[#allocation5 + $0x114] sm:$0xf0] }
  0xbb   :  { %2131 = vmatpush.bf16.msrb.mxu2 %v3284_v39  ;;  %v2969_v39 = vld [vmem:[#allocation5 + $0x4d0] sm:$0xf0]  ;;  %v2904_v32 = vor.u32 %v3646_v25, %v2903_v24  ;;  %v2687_v36 = vld [vmem:[#allocation5 + $0x280] sm:$0xf]  ;;  %v2999_v25 = vld [vmem:[#allocation5 + $0x4f0] sm:$0xf] }
  0xbc   :  { %2144 = vmatpush.bf16.msrb.mxu3 %v3476_v43  ;;  %v3353_v43 = vld [vmem:[#allocation5 + $0x7d0] sm:$0xf0]  ;;  %v2972_v48 = vor.u32 %v3660_v33, %v2969_v39  ;;  %v1880_v58 = vadd.f32 %v1879_v53, %v1867_v44  ;;  %v1892_v59 = vpop.f32.mrf.mxu3  ;;  %v2495_v33 = vld [vmem:[#allocation5 + $0x100] sm:$0xf]  ;;  %v3592_v39 = vld [vmem:[#allocation5 + $0x294] sm:$0xf0] }
  0xbd   :  { %2106 = vmatpush.bf16.msrb.mxu0 %v2876_v49  ;;  %v3164_v49 = vor.u32 %v3708_v40, %v3161_v41  ;;  %v3356_v54 = vor.u32 %v3756_v42, %v3353_v43  ;;  %v2879_v40 = vld [vmem:[#allocation5 + $0x400] sm:$0xf]  ;;  %v3640_v41 = vld [vmem:[#allocation5 + $0x414] sm:$0xf0]  ;;  %v2496_v44 = vor.u32 %v3544_v34, %v2495_v33  ;;  %v3634_v53 = vld [vmem:[#allocation5 + $0x3e4] sm:$0xf0] }
  0xbe   :  { %2119 = vmatpush.bf16.msrb.mxu1 %v3068_v50  ;;  %v3654_v50 = vld [vmem:[#allocation5 + $0x48c] sm:$0xf]  ;;  %v3989_v3 = vadd.f32 %v1892_v59, %v1880_v58  ;;  %v3071_v42 = vld [vmem:[#allocation5 + $0x580] sm:$0xf]  ;;  %v3688_v43 = vld [vmem:[#allocation5 + $0x594] sm:$0xf0] }
  0xbf   :  { %2132 = vmatpush.bf16.msrb.mxu2 %v3260_v51  ;;  %v2945_v51 = vld [vmem:[#allocation5 + $0x4a0] sm:$0xf0]  ;;  %v2399_v34 = vld [vmem:[#allocation5 + $0x40] sm:$0xf] }
  0xc0   :  { %2145 = vmatpush.bf16.msrb.mxu3 %v3452_v55  ;;  %v3137_v55 = vld [vmem:[#allocation5 + $0x620] sm:$0xf0]  ;;  %v2948_v5 = vor.u32 %v3654_v50, %v2945_v51  ;;  %v3072_v50 = vor.u32 %v3688_v43, %v3071_v42  ;;  %v3586_v51 = vld [vmem:[#allocation5 + $0x264] sm:$0xf0]  ;;  %v2783_v42 = vld [vmem:[#allocation5 + $0x340] sm:$0xf] }
  0xc1   :  { %2107 = vmatpush.bf16.msrb.mxu0 %v2852_v61  ;;  %v3556_v61 = vld [vmem:[#allocation5 + $0x174] sm:$0xf0]  ;;  %v3140_v6 = vor.u32 %v3702_v52, %v3137_v55  ;;  %v1881_v28 = vpop.f32.mrf.mxu2  ;;  %v2855_v52 = vld [vmem:[#allocation5 + $0x3d0] sm:$0xf]  ;;  %v3682_v55 = vld [vmem:[#allocation5 + $0x564] sm:$0xf0] }
  0xc2   :  { %2120 = vmatpush.bf16.msrb.mxu1 %v3044_v63  ;;  %v2756_v63 = vor.u32 %v3606_v46, %v2753_v47  ;;  %v2880_v46 = vor.u32 %v3640_v41, %v2879_v40  ;;  %v2471_v47 = vld [vmem:[#allocation5 + $0xd0] sm:$0xf]  ;;  %v3568_v41 = vld [vmem:[#allocation5 + $0x1d4] sm:$0xf0] }
  0xc3   :  { %2133 = vmatpush.bf16.msrb.mxu2 %v3236_v0  ;;  %v3604_v0 = vld [vmem:[#allocation5 + $0x2f4] sm:$0xf0] }
  0xc4   :  { %2146 = vmatpush.bf16.msrb.mxu3 %v3428_v4  ;;  %v1855_v4 = vpop.f32.mrf.mxu0  ;;  %v3616_v43 = vld [vmem:[#allocation5 + $0x354] sm:$0xf0] }
  0xc5   :  { %2108 = vmatpush.bf16.msrb.mxu0 %v2828_v10  ;;  %v1868_v10 = vpop.f32.mrf.mxu1  ;;  %v2831_v4 = vld [vmem:[#allocation5 + $0x3a0] sm:$0xf] }
  0xc6   :  { %2121 = vmatpush.bf16.msrb.mxu1 %v3020_v12  ;;  %v2544_v12 = vor.u32 %v3556_v61, %v2543_v60  ;;  %v2856_v61 = vor.u32 %v3634_v53, %v2855_v52  ;;  %v372_v10 = vperm.slane %v3986_v7, 1  ;;  %v3562_v52 = vld [vmem:[#allocation5 + $0x1a4] sm:$0xf0]  ;;  %v2759_v53 = vld [vmem:[#allocation5 + $0x310] sm:$0xf] }
  0xc7   :  { %2134 = vmatpush.bf16.msrb.mxu2 %v3212_v13  ;;  %v2736_v13 = vor.u32 %v3604_v0, %v2735_v62  ;;  %v2447_v62 = vld [vmem:[#allocation5 + $0xa0] sm:$0xf] }
  0xc8   :  { %2147 = vmatpush.bf16.msrb.mxu3 %v3404_v17  ;;  %v2711_v17 = vld [vmem:[#allocation5 + $0x2b0] sm:$0xf]  ;;  %v2639_v0 = vld [vmem:[#allocation5 + $0x220] sm:$0xf] }
  0xc9   :  { %2109 = vmatpush.bf16.msrb.mxu0 %v2804_v27  ;;  %v3694_v27 = vld [vmem:[#allocation5 + $0x5c4] sm:$0xf0]  ;;  %v2712_v31 = vor.u32 %v3598_v23, %v2711_v17 }
  0xca   :  { %2122 = vmatpush.bf16.msrb.mxu1 %v2996_v29  ;;  %v2520_v29 = vor.u32 %v3550_v16, %v2519_v15  ;;  %v2615_v15 = vld [vmem:[#allocation5 + $0x1f0] sm:$0xf]  ;;  %v3024_v16 = vor.u32 %v3676_v9, %v3023_v8  ;;  %v3574_v17 = vld [vmem:[#allocation5 + $0x204] sm:$0xf0]  ;;  %v3601_v8 = vld [vmem:[#allocation5 + $0x2e4] sm:$0xf] }
  0xcb   :  { %2135 = vmatpush.bf16.msrb.mxu2 %v3188_v30  ;;  %v1894_v30 = vpop.f32.mrf.mxu3  ;;  %v3622_v23 = vld [vmem:[#allocation5 + $0x384] sm:$0xf0]  ;;  %v2737_v9 = vld [vmem:[#allocation5 + $0x2f8] sm:$0xf0] }
  0xcc   :  { %2148 = vmatpush.bf16.msrb.mxu3 %v3380_v37  ;;  %v3096_v37 = vor.u32 %v3694_v27, %v3095_v26  ;;  %v3670_v26 = vld [vmem:[#allocation5 + $0x504] sm:$0xf0] }
  0xcd   :  { %2110 = vmatpush.bf16.msrb.mxu0 %v2780_v45  ;;  %v2688_v45 = vor.u32 %v3592_v39, %v2687_v36  ;;  %v3520_v36 = vld [vmem:[#allocation5 + $0x54] sm:$0xf0]  ;;  %v3000_v40 = vor.u32 %v3670_v26, %v2999_v25  ;;  %v2713_v25 = vld [vmem:[#allocation5 + $0x2c8] sm:$0xf0] }
  0xce   :  { %2123 = vmatpush.bf16.msrb.mxu1 %v2972_v48  ;;  %v3538_v48 = vld [vmem:[#allocation5 + $0xe4] sm:$0xf0] }
  0xcf   :  { %2136 = vmatpush.bf16.msrb.mxu2 %v3164_v49  ;;  %v2663_v49 = vld [vmem:[#allocation5 + $0x250] sm:$0xf]  ;;  %v2472_v57 = vor.u32 %v3538_v48, %v2471_v47  ;;  %v3514_v48 = vld [vmem:[#allocation5 + $0x24] sm:$0xf0] }
  0xd0   :  { %2149 = vmatpush.bf16.msrb.mxu3 %v3356_v54  ;;  %v3047_v54 = vld [vmem:[#allocation5 + $0x550] sm:$0xf]  ;;  %v2664_v60 = vor.u32 %v3586_v51, %v2663_v49 }
  0xd1   :  { %2111 = vmatpush.bf16.msrb.mxu0 %v2756_v63  ;;  %v1905_v56 = vpop.f32.mrf.mxu0  ;;  %v3532_v63 = vld [vmem:[#allocation5 + $0xb4] sm:$0xf0]  ;;  %v3048_v1 = vor.u32 %v3682_v55, %v3047_v54  ;;  %v2375_v47 = vld [vmem:[#allocation5 + $0x10] sm:$0xf]  ;;  %v3610_v55 = vld [vmem:[#allocation5 + $0x324] sm:$0xf0] }
  0xd2   :  { %2124 = vmatpush.bf16.msrb.mxu1 %v2948_v5  ;;  %v1906_v58 = vadd.f32 %v1905_v56, %v3989_v3  ;;  %v1918_v59 = vpop.f32.mrf.mxu1  ;;  %v3628_v5 = vld [vmem:[#allocation5 + $0x3b4] sm:$0xf0]  ;;  %v2448_v3 = vor.u32 %v3532_v63, %v2447_v62  ;;  %v2567_v51 = vld [vmem:[#allocation5 + $0x190] sm:$0xf]  ;;  %v2376_v63 = vor.u32 %v3514_v48, %v2375_v47  ;;  %v3778_v48 = vld [vmem:[#allocation5 + $0x864] sm:$0xf0] }
  0xd3   :  { %2137 = vmatpush.bf16.msrb.mxu2 %v3140_v6  ;;  %v2951_v56 = vld [vmem:[#allocation5 + $0x490] sm:$0xf] }
  0xd4   :  { %2150 = vmatpush.bf16.msrb.mxu3 %v3332_v11  ;;  %2112 = vmatmul.bf16.vlgmr.msrb.gmra.mxu0 %v3954_v18  ;;  %v3996_v6 = vadd.f32 %v1918_v59, %v1906_v58  ;;  %v2640_v11 = vor.u32 %v3580_v2, %v2639_v0  ;;  %v3311_v59 = vld [vmem:[#allocation5 + $0x760] sm:$0xf]  ;;  %v3796_v0 = vld [vmem:[#allocation5 + $0x8f4] sm:$0xf0]  ;;  %v2545_v2 = vld [vmem:[#allocation5 + $0x178] sm:$0xf0] }
  0xd5   :  { %2156 = vmatpush.bf16.msra.mxu0 %v2544_v12  ;;  %2125 = vmatmul.bf16.vlgmr.msrb.gmra.mxu1 %v3958_v20  ;;  %v2832_v12 = vor.u32 %v3628_v5, %v2831_v4  ;;  %v2568_v4 = vor.u32 %v3562_v52, %v2567_v51  ;;  %v2760_v5 = vor.u32 %v3610_v55, %v2759_v53  ;;  %v3583_v51 = vld [vmem:[#allocation5 + $0x254] sm:$0xf]  ;;  %v2665_v52 = vld [vmem:[#allocation5 + $0x268] sm:$0xf0] }
  0xd6   :  { %2169 = vmatpush.bf16.msra.mxu1 %v2736_v13  ;;  %2138 = vmatmul.bf16.vlgmr.msrb.gmra.mxu2 %v3966_v35  ;;  %v2423_v13 = vld [vmem:[#allocation5 + $0x70] sm:$0xf] }
  0xd7   :  { %2182 = vmatpush.bf16.msra.mxu2 %v2928_v14  ;;  %2151 = vmatmul.bf16.vlgmr.msrb.gmra.mxu3 %v3968_v38  ;;  %v3526_v14 = vld [vmem:[#allocation5 + $0x84] sm:$0xf0] }
  0xd8   :  { %2195 = vmatpush.bf16.msra.mxu3 %v3120_v21  ;;  %v2807_v21 = vld [vmem:[#allocation5 + $0x370] sm:$0xf]  ;;  %v2424_v30 = vor.u32 %v3526_v14, %v2423_v13  ;;  %v3742_v14 = vld [vmem:[#allocation5 + $0x744] sm:$0xf0] }
  0xd9   :  { %2157 = vmatpush.bf16.msra.mxu0 %v2520_v29  ;;  %v1931_v24 = vpop.f32.mrf.mxu2  ;;  %v1907_v29 = vpop.f32.mrf.mxu0  ;;  %v2808_v33 = vor.u32 %v3622_v23, %v2807_v21  ;;  %v3287_v13 = vld [vmem:[#allocation5 + $0x730] sm:$0xf]  ;;  %v3547_v21 = vld [vmem:[#allocation5 + $0x134] sm:$0xf]  ;;  %v2521_v23 = vld [vmem:[#allocation5 + $0x148] sm:$0xf0] }
  0xda   :  { %2170 = vmatpush.bf16.msra.mxu1 %v2712_v31  ;;  %v1932_v27 = vadd.f32 %v1931_v24, %v372_v10  ;;  %v1944_v28 = vpop.f32.mrf.mxu3  ;;  %v1920_v31 = vpop.f32.mrf.mxu1  ;;  %v3595_v24 = vld [vmem:[#allocation5 + $0x2b4] sm:$0xf]  ;;  %v3288_v26 = vor.u32 %v3742_v14, %v3287_v13  ;;  %v3263_v29 = vld [vmem:[#allocation5 + $0x700] sm:$0xf]  ;;  %v3383_v13 = vld [vmem:[#allocation5 + $0x7f0] sm:$0xf] }
  0xdb   :  { %2183 = vmatpush.bf16.msra.mxu2 %v2904_v32  ;;  %v2616_v32 = vor.u32 %v3574_v17, %v2615_v15  ;;  %v3479_v15 = vld [vmem:[#allocation5 + $0x8b0] sm:$0xf]  ;;  %v3790_v17 = vld [vmem:[#allocation5 + $0x8c4] sm:$0xf0]  ;;  %v3455_v31 = vld [vmem:[#allocation5 + $0x880] sm:$0xf] }
  0xdc   :  { %2196 = vmatpush.bf16.msra.mxu3 %v3096_v37  ;;  %v2591_v37 = vld [vmem:[#allocation5 + $0x1c0] sm:$0xf]  ;;  %v3999_v39 = vadd.f32 %v1944_v28, %v1932_v27  ;;  %v3480_v27 = vor.u32 %v3790_v17, %v3479_v15  ;;  %v2524_v28 = vor.u32 %v3547_v21, %v2521_v23  ;;  %v3766_v17 = vld [vmem:[#allocation5 + $0x804] sm:$0xf0]  ;;  %v3523_v21 = vld [vmem:[#allocation5 + $0x74] sm:$0xf] }
  0xdd   :  { %2158 = vmatpush.bf16.msra.mxu0 %v2496_v44  ;;  %v2975_v44 = vld [vmem:[#allocation5 + $0x4c0] sm:$0xf]  ;;  %v2592_v49 = vor.u32 %v3568_v41, %v2591_v37  ;;  %v3589_v37 = vld [vmem:[#allocation5 + $0x284] sm:$0xf]  ;;  %v2425_v23 = vld [vmem:[#allocation5 + $0x88] sm:$0xf0] }
  0xde   :  { %2171 = vmatpush.bf16.msra.mxu1 %v2688_v45  ;;  %v3664_v45 = vld [vmem:[#allocation5 + $0x4d4] sm:$0xf0] }
  0xdf   :  { %2184 = vmatpush.bf16.msra.mxu2 %v2880_v46  ;;  %v2400_v46 = vor.u32 %v3520_v36, %v2399_v34  ;;  %v2976_v54 = vor.u32 %v3664_v45, %v2975_v44  ;;  %v3541_v34 = vld [vmem:[#allocation5 + $0x104] sm:$0xf]  ;;  %v2497_v36 = vld [vmem:[#allocation5 + $0x118] sm:$0xf0]  ;;  %v3239_v44 = vld [vmem:[#allocation5 + $0x6d0] sm:$0xf] }
  0xe0   :  { %2197 = vmatpush.bf16.msra.mxu3 %v3072_v50  ;;  %v2784_v50 = vor.u32 %v3616_v43, %v2783_v42  ;;  %v2500_v43 = vor.u32 %v3541_v34, %v2497_v36  ;;  %v3730_v45 = vld [vmem:[#allocation5 + $0x6e4] sm:$0xf0]  ;;  %v2428_v34 = vor.u32 %v3523_v21, %v2425_v23  ;;  %v3712_v36 = vld [vmem:[#allocation5 + $0x654] sm:$0xf0]  ;;  %v2905_v21 = vld [vmem:[#allocation5 + $0x448] sm:$0xf0] }
  0xe1   :  { %2159 = vmatpush.bf16.msra.mxu0 %v2472_v57  ;;  %v3658_v57 = vld [vmem:[#allocation5 + $0x4a4] sm:$0xf0]  ;;  %v1933_v58 = vpop.f32.mrf.mxu2  ;;  %v3240_v53 = vor.u32 %v3730_v45, %v3239_v44  ;;  %v3517_v44 = vld [vmem:[#allocation5 + $0x44] sm:$0xf]  ;;  %v3691_v23 = vld [vmem:[#allocation5 + $0x5b4] sm:$0xf] }
  0xe2   :  { %2172 = vmatpush.bf16.msra.mxu1 %v2664_v60  ;;  %v3748_v60 = vld [vmem:[#allocation5 + $0x774] sm:$0xf0]  ;;  %v1946_v62 = vpop.f32.mrf.mxu3  ;;  %v2952_v10 = vor.u32 %v3658_v57, %v2951_v56  ;;  %v3565_v45 = vld [vmem:[#allocation5 + $0x1c4] sm:$0xf] }
  0xe3   :  { %2185 = vmatpush.bf16.msra.mxu2 %v2856_v61  ;;  %v3503_v61 = vld [vmem:[#allocation5 + $0x8e0] sm:$0xf]  ;;  %v2668_v62 = vor.u32 %v3583_v51, %v2665_v52  ;;  %v3706_v51 = vld [vmem:[#allocation5 + $0x624] sm:$0xf0] }
  0xe4   :  { %2198 = vmatpush.bf16.msra.mxu3 %v3048_v1  ;;  %v3553_v1 = vld [vmem:[#allocation5 + $0x164] sm:$0xf] }
  0xe5   :  { %2160 = vmatpush.bf16.msra.mxu0 %v2448_v3  ;;  %v3312_v3 = vor.u32 %v3748_v60, %v3311_v59  ;;  %v3215_v59 = vld [vmem:[#allocation5 + $0x6a0] sm:$0xf]  ;;  %v3724_v60 = vld [vmem:[#allocation5 + $0x6b4] sm:$0xf0] }
  0xe6   :  { %2173 = vmatpush.bf16.msra.mxu1 %v2640_v11  ;;  %v3504_v11 = vor.u32 %v3796_v0, %v3503_v61  ;;  %v3407_v61 = vld [vmem:[#allocation5 + $0x820] sm:$0xf]  ;;  %v3529_v0 = vld [vmem:[#allocation5 + $0xa4] sm:$0xf] }
  0xe7   :  { %2186 = vmatpush.bf16.msra.mxu2 %v2832_v12  ;;  %v2548_v12 = vor.u32 %v3553_v1, %v2545_v2  ;;  %v2449_v1 = vld [vmem:[#allocation5 + $0xb8] sm:$0xf0] }
  0xe8   :  { %2199 = vmatpush.bf16.msra.mxu3 %v3024_v16  ;;  %v2740_v16 = vor.u32 %v3601_v8, %v2737_v9  ;;  %v4006_v8 = vld [vmem:[#allocation8] sm:$0x3f]  ;;  %v3216_v9 = vor.u32 %v3724_v60, %v3215_v59  ;;  %v2377_v60 = vld [vmem:[#allocation5 + $0x28] sm:$0xf0] }
  0xe9   :  { %2161 = vmatpush.bf16.msra.mxu0 %v2424_v30  ;;  %v3736_v30 = vld [vmem:[#allocation5 + $0x714] sm:$0xf0] }
  0xea   :  { %2174 = vmatpush.bf16.msra.mxu1 %v2616_v32  ;;  %v2716_v32 = vor.u32 %v3595_v24, %v2713_v25  ;;  %v3264_v41 = vor.u32 %v3736_v30, %v3263_v29  ;;  %v2320_v24 = vperm.slane %v4006_v8, 0  ;;  %v3571_v25 = vld [vmem:[#allocation5 + $0x1f4] sm:$0xf]  ;;  %v2321_v29 = vperm.slane %v4006_v8, 1 }
  0xeb   :  { %2187 = vmatpush.bf16.msra.mxu2 %v2808_v33  ;;  %v3784_v33 = vld [vmem:[#allocation5 + $0x894] sm:$0xf0] }
  0xec   :  { %2200 = vmatpush.bf16.msra.mxu3 %v3000_v40  ;;  %v2689_v40 = vld [vmem:[#allocation5 + $0x298] sm:$0xf0]  ;;  %v3456_v42 = vor.u32 %v3784_v33, %v3455_v31  ;;  %v3167_v31 = vld [vmem:[#allocation5 + $0x640] sm:$0xf]  ;;  %v3384_v33 = vor.u32 %v3766_v17, %v3383_v13  ;;  %v3643_v17 = vld [vmem:[#allocation5 + $0x434] sm:$0xf] }
  0xed   :  { %2162 = vmatpush.bf16.msra.mxu0 %v2400_v46  ;;  %v3431_v46 = vld [vmem:[#allocation5 + $0x850] sm:$0xf]  ;;  %v2692_v47 = vor.u32 %v3589_v37, %v2689_v40  ;;  %v3359_v37 = vld [vmem:[#allocation5 + $0x7c0] sm:$0xf]  ;;  %v3760_v40 = vld [vmem:[#allocation5 + $0x7d4] sm:$0xf0] }
  0xee   :  { %2175 = vmatpush.bf16.msra.mxu1 %v2592_v49  ;;  %v3535_v49 = vld [vmem:[#allocation5 + $0xd4] sm:$0xf]  ;;  %v3432_v55 = vor.u32 %v3778_v48, %v3431_v46  ;;  %v2593_v46 = vld [vmem:[#allocation5 + $0x1d8] sm:$0xf0]  ;;  %v3360_v52 = vor.u32 %v3760_v40, %v3359_v37 }
  0xef   :  { %2188 = vmatpush.bf16.msra.mxu2 %v2784_v50  ;;  %v2473_v50 = vld [vmem:[#allocation5 + $0xe8] sm:$0xf0]  ;;  %v2596_v59 = vor.u32 %v3565_v45, %v2593_v46  ;;  %v3073_v40 = vld [vmem:[#allocation5 + $0x598] sm:$0xf0]  ;;  %v373_v45 = vperm.slane %v3986_v7, 2 }
  0xf0   :  { %2201 = vmatpush.bf16.msra.mxu3 %v2976_v54  ;;  %v2476_v56 = vor.u32 %v3535_v49, %v2473_v50  ;;  %v3168_v49 = vor.u32 %v3712_v36, %v3167_v31  ;;  %v3143_v50 = vld [vmem:[#allocation5 + $0x610] sm:$0xf]  ;;  %v3685_v36 = vld [vmem:[#allocation5 + $0x584] sm:$0xf] }
  0xf1   :  { %2163 = vmatpush.bf16.msra.mxu0 %v2376_v63  ;;  %v1957_v54 = vpop.f32.mrf.mxu0  ;;  %v3772_v63 = vld [vmem:[#allocation5 + $0x834] sm:$0xf0]  ;;  %v3076_v46 = vor.u32 %v3685_v36, %v3073_v40  ;;  %v3661_v36 = vld [vmem:[#allocation5 + $0x4c4] sm:$0xf] }
  0xf2   :  { %2176 = vmatpush.bf16.msra.mxu1 %v2568_v4  ;;  %v1958_v57 = vadd.f32 %v1957_v54, %v3999_v39  ;;  %v1970_v58 = vpop.f32.mrf.mxu1  ;;  %v3577_v4 = vld [vmem:[#allocation5 + $0x224] sm:$0xf]  ;;  %v2452_v39 = vor.u32 %v3529_v0, %v2449_v1  ;;  %v3335_v54 = vld [vmem:[#allocation5 + $0x790] sm:$0xf]  ;;  %v2929_v1 = vld [vmem:[#allocation5 + $0x478] sm:$0xf0] }
  0xf3   :  { %2189 = vmatpush.bf16.msra.mxu2 %v2760_v5  ;;  %v2641_v5 = vld [vmem:[#allocation5 + $0x238] sm:$0xf0]  ;;  %v3649_v0 = vld [vmem:[#allocation5 + $0x464] sm:$0xf] }
  0xf4   :  { %2202 = vmatpush.bf16.msra.mxu3 %v2952_v10  ;;  %2164 = vmatmul.bf16.vlgmr.msra.gmra.mxu0 %v3956_v19  ;;  %v1971_v2 = vadd.f32 %v1970_v58, %v1958_v57  ;;  %v3408_v10 = vor.u32 %v3772_v63, %v3407_v61  ;;  %v2644_v14 = vor.u32 %v3577_v4, %v2641_v5  ;;  %v3559_v61 = vld [vmem:[#allocation5 + $0x194] sm:$0xf]  ;;  %v3121_v5 = vld [vmem:[#allocation5 + $0x5f8] sm:$0xf0] }
  0xf5   :  { %2208 = vmatpush.bf16.msrb.mxu0 %v3312_v3  ;;  %2177 = vmatmul.bf16.vlgmr.msra.gmra.mxu1 %v3960_v22  ;;  %v3144_v4 = vor.u32 %v3706_v51, %v3143_v50  ;;  %v3679_v50 = vld [vmem:[#allocation5 + $0x554] sm:$0xf] }
  0xf6   :  { %2221 = vmatpush.bf16.msrb.mxu1 %v3504_v11  ;;  %2190 = vmatmul.bf16.vlgmr.msra.gmra.mxu2 %v3954_v18  ;;  %v3191_v11 = vld [vmem:[#allocation5 + $0x670] sm:$0xf] }
  0xf7   :  { %2234 = vmatpush.bf16.msrb.mxu2 %v2548_v12  ;;  %2203 = vmatmul.bf16.vlgmr.msra.gmra.mxu3 %v3958_v20  ;;  %v3718_v12 = vld [vmem:[#allocation5 + $0x684] sm:$0xf0] }
  0xf8   :  { %2247 = vmatpush.bf16.msrb.mxu3 %v2740_v16  ;;  %v3192_v30 = vor.u32 %v3718_v12, %v3191_v11  ;;  %v3793_v11 = vld [vmem:[#allocation5 + $0x8e4] sm:$0xf]  ;;  %v3505_v12 = vld [vmem:[#allocation5 + $0x8f8] sm:$0xf0] }
  0xf9   :  { %2209 = vmatpush.bf16.msrb.mxu0 %v3288_v26  ;;  %v1983_v3 = vpop.f32.mrf.mxu2  ;;  %v2617_v26 = vld [vmem:[#allocation5 + $0x208] sm:$0xf0] }
  0xfa   :  { %2222 = vmatpush.bf16.msrb.mxu1 %v3480_v27  ;;  %v1984_v15 = vadd.f32 %v1983_v3, %v1971_v2  ;;  %v1996_v16 = vpop.f32.mrf.mxu3  ;;  %v2312_v27 = vmax.f32 %v3996_v6, 0.0  ;;  %v2401_v6 = vld [vmem:[#allocation5 + $0x58] sm:$0xf0]  ;;  %v3697_v2 = vld [vmem:[#allocation5 + $0x5e4] sm:$0xf] }
  0xfb   :  { %2235 = vmatpush.bf16.msrb.mxu2 %v2524_v28 }
  0xfc   :  { %2248 = vmatpush.bf16.msrb.mxu3 %v2716_v32  ;;  %v1997_v28 = vadd.f32 %v1996_v16, %v1984_v15  ;;  %v1959_v32 = vpop.f32.mrf.mxu0  ;;  %v3124_v15 = vor.u32 %v3697_v2, %v3121_v5  ;;  %v3721_v2 = vld [vmem:[#allocation5 + $0x6a4] sm:$0xf] }
  0xfd   :  { %2210 = vmatpush.bf16.msrb.mxu0 %v3264_v41  ;;  %v1972_v41 = vpop.f32.mrf.mxu1 }
  0xfe   :  { %2223 = vmatpush.bf16.msrb.mxu1 %v3456_v42  ;;  %v2313_v42 = vmax.f32 %v1997_v28, 0.0  ;;  %v3787_v28 = vld [vmem:[#allocation5 + $0x8b4] sm:$0xf]  ;;  %v3733_v41 = vld [vmem:[#allocation5 + $0x704] sm:$0xf] }
  0xff   :  { %2236 = vmatpush.bf16.msrb.mxu2 %v2500_v43  ;;  %v2620_v43 = vor.u32 %v3571_v25, %v2617_v26  ;;  %v3097_v25 = vld [vmem:[#allocation5 + $0x5c8] sm:$0xf0]  ;;  %v3739_v26 = vld [vmem:[#allocation5 + $0x734] sm:$0xf] }
 0x100   :  { %2249 = vmatpush.bf16.msrb.mxu3 %v2692_v47  ;;  %v2332_v47 = vmul.f32 %v2320_v24, %v2312_v27  ;;  %v2333_v48 = vmul.f32 %v2321_v29, %v2313_v42  ;;  %v3508_v24 = vor.u32 %v3793_v11, %v3505_v12  ;;  %v3289_v27 = vld [vmem:[#allocation5 + $0x748] sm:$0xf0]  ;;  %v3100_v31 = vor.u32 %v3691_v23, %v3097_v25  ;;  %v3265_v42 = vld [vmem:[#allocation5 + $0x718] sm:$0xf0]  ;;  %v3619_v12 = vld [vmem:[#allocation5 + $0x374] sm:$0xf] }
 0x101   :  { %2211 = vmatpush.bf16.msrb.mxu0 %v3240_v53  ;;  %v2404_v53 = vor.u32 %v3517_v44, %v2401_v6  ;;  %v1985_v57 = vpop.f32.mrf.mxu2  ;;  %v3481_v29 = vld [vmem:[#allocation5 + $0x8c8] sm:$0xf0]  ;;  %v3292_v32 = vor.u32 %v3739_v26, %v3289_v27  ;;  %v3457_v44 = vld [vmem:[#allocation5 + $0x898] sm:$0xf0] }
 0x102   :  { %2224 = vmatpush.bf16.msrb.mxu1 %v3432_v55  ;;  %v3754_v55 = vld [vmem:[#allocation5 + $0x7a4] sm:$0xf0]  ;;  %v4011_v58 = vadd.f32 %v2333_v48, %v2332_v47  ;;  %v1998_v63 = vpop.f32.mrf.mxu3  ;;  %v3484_v37 = vor.u32 %v3787_v28, %v3481_v29  ;;  %v3268_v47 = vor.u32 %v3733_v41, %v3265_v42  ;;  %v3631_v48 = vld [vmem:[#allocation5 + $0x3d4] sm:$0xf]  ;;  %v3385_v25 = vld [vmem:[#allocation5 + $0x808] sm:$0xf0] }
 0x103   :  { %2237 = vmatpush.bf16.msrb.mxu2 %v2476_v56  ;;  %v3511_v56 = vld [vmem:[#allocation5 + $0x14] sm:$0xf]  ;;  %v3673_v63 = vld [vmem:[#allocation5 + $0x524] sm:$0xf]  ;;  %v2977_v41 = vld [vmem:[#allocation5 + $0x4d8] sm:$0xf0] }
 0x104   :  { %2250 = vmatpush.bf16.msrb.mxu3 %v2668_v62  ;;  %v2569_v62 = vld [vmem:[#allocation5 + $0x1a8] sm:$0xf0]  ;;  %v2380_v3 = vor.u32 %v3511_v56, %v2377_v60  ;;  %v3709_v42 = vld [vmem:[#allocation5 + $0x644] sm:$0xf] }
 0x105   :  { %2212 = vmatpush.bf16.msrb.mxu0 %v3216_v9  ;;  %v3745_v9 = vld [vmem:[#allocation5 + $0x764] sm:$0xf]  ;;  %v2572_v13 = vor.u32 %v3559_v61, %v2569_v62  ;;  %v2833_v62 = vld [vmem:[#allocation5 + $0x3b8] sm:$0xf0] }
 0x106   :  { %2225 = vmatpush.bf16.msrb.mxu1 %v3408_v10  ;;  %v3313_v10 = vld [vmem:[#allocation5 + $0x778] sm:$0xf0]  ;;  %v3625_v61 = vld [vmem:[#allocation5 + $0x3a4] sm:$0xf] }
 0x107   :  { %2238 = vmatpush.bf16.msrb.mxu2 %v2452_v39  ;;  %v3336_v39 = vor.u32 %v3754_v55, %v3335_v54  ;;  %v3316_v16 = vor.u32 %v3745_v9, %v3313_v10  ;;  %v3775_v54 = vld [vmem:[#allocation5 + $0x854] sm:$0xf]  ;;  %v3433_v55 = vld [vmem:[#allocation5 + $0x868] sm:$0xf0]  ;;  %v3769_v9 = vld [vmem:[#allocation5 + $0x824] sm:$0xf] }
 0x108   :  { %2251 = vmatpush.bf16.msrb.mxu3 %v2644_v14  ;;  %v2932_v14 = vor.u32 %v3649_v0, %v2929_v1  ;;  %v3436_v0 = vor.u32 %v3775_v54, %v3433_v55  ;;  %v3025_v1 = vld [vmem:[#allocation5 + $0x538] sm:$0xf0]  ;;  %v3751_v55 = vld [vmem:[#allocation5 + $0x794] sm:$0xf] }
 0x109   :  { %2213 = vmatpush.bf16.msrb.mxu0 %v3192_v30  ;;  %v2908_v30 = vor.u32 %v3643_v17, %v2905_v21  ;;  %v3409_v10 = vld [vmem:[#allocation5 + $0x838] sm:$0xf0]  ;;  %v3715_v17 = vld [vmem:[#allocation5 + $0x674] sm:$0xf]  ;;  %v3193_v21 = vld [vmem:[#allocation5 + $0x688] sm:$0xf0] }
 0x10a   :  { %2226 = vmatpush.bf16.msrb.mxu1 %v3384_v33  ;;  %v3637_v33 = vld [vmem:[#allocation5 + $0x404] sm:$0xf] }
 0x10b   :  { %2239 = vmatpush.bf16.msrb.mxu2 %v2428_v34  ;;  %v2881_v34 = vld [vmem:[#allocation5 + $0x418] sm:$0xf0] }
 0x10c   :  { %2252 = vmatpush.bf16.msrb.mxu3 %v2620_v43  ;;  %v3781_v43 = vld [vmem:[#allocation5 + $0x884] sm:$0xf]  ;;  %v2884_v6 = vor.u32 %v3637_v33, %v2881_v34  ;;  %v2785_v34 = vld [vmem:[#allocation5 + $0x358] sm:$0xf0] }
 0x10d   :  { %2214 = vmatpush.bf16.msrb.mxu0 %v3168_v49  ;;  %v2857_v49 = vld [vmem:[#allocation5 + $0x3e8] sm:$0xf0]  ;;  %v3460_v51 = vor.u32 %v3781_v43, %v3457_v44  ;;  %v3613_v33 = vld [vmem:[#allocation5 + $0x344] sm:$0xf]  ;;  %v3169_v43 = vld [vmem:[#allocation5 + $0x658] sm:$0xf0] }
 0x10e   :  { %2227 = vmatpush.bf16.msrb.mxu1 %v3360_v52  ;;  %v3049_v52 = vld [vmem:[#allocation5 + $0x568] sm:$0xf0]  ;;  %v2860_v57 = vor.u32 %v3631_v48, %v2857_v49  ;;  %v3757_v44 = vld [vmem:[#allocation5 + $0x7c4] sm:$0xf]  ;;  %v3607_v48 = vld [vmem:[#allocation5 + $0x314] sm:$0xf] }
 0x10f   :  { %2240 = vmatpush.bf16.msrb.mxu2 %v2404_v53  ;;  %v3727_v53 = vld [vmem:[#allocation5 + $0x6d4] sm:$0xf]  ;;  %v3052_v7 = vor.u32 %v3679_v50, %v3049_v52  ;;  %v2761_v49 = vld [vmem:[#allocation5 + $0x328] sm:$0xf0] }
 0x110   :  { %2253 = vmatpush.bf16.msrb.mxu3 %v2596_v59  ;;  %v3655_v50 = vld [vmem:[#allocation5 + $0x494] sm:$0xf]  ;;  %v2953_v52 = vld [vmem:[#allocation5 + $0x4a8] sm:$0xf0] }
 0x111   :  { %2215 = vmatpush.bf16.msrb.mxu0 %v3144_v4  ;;  %v2009_v56 = vpop.f32.mrf.mxu0  ;;  %v3217_v4 = vld [vmem:[#allocation5 + $0x6b8] sm:$0xf0] }
 0x112   :  { %2228 = vmatpush.bf16.msrb.mxu1 %v3336_v39  ;;  %v2022_v59 = vpop.f32.mrf.mxu1  ;;  %v2836_v39 = vor.u32 %v3625_v61, %v2833_v62  ;;  %v3220_v11 = vor.u32 %v3721_v2, %v3217_v4  ;;  %v3803_v2 = vld [vmem:[#allocation7] sm:$0x3f] }
 0x113   :  { %2241 = vmatpush.bf16.msrb.mxu2 %v2380_v3  ;;  %v3028_v3 = vor.u32 %v3673_v63, %v3025_v1  ;;  %v2322_v1 = vperm.slane %v4006_v8, 2  ;;  %v374_v4 = vperm.slane %v3803_v2, 3 }
 0x114   :  { %2254 = vmatpush.bf16.msrb.mxu3 %v2572_v13  ;;  %2216 = vmatmul.bf16.vlgmr.msrb.gmra.mxu0 %v3966_v35  ;;  %v2809_v13 = vld [vmem:[#allocation5 + $0x388] sm:$0xf0] }
 0x115   :  { %2260 = vmatpush.bf16.msra.mxu0 %v2932_v14  ;;  %2229 = vmatmul.bf16.vlgmr.msrb.gmra.mxu1 %v3968_v38  ;;  %v3667_v14 = vld [vmem:[#allocation5 + $0x4f4] sm:$0xf]  ;;  %v2812_v29 = vor.u32 %v3619_v12, %v2809_v13 }
 0x116   :  { %2273 = vmatpush.bf16.msra.mxu1 %v3124_v15  ;;  %2242 = vmatmul.bf16.vlgmr.msrb.gmra.mxu2 %v3956_v19  ;;  %v3241_v19 = vld [vmem:[#allocation5 + $0x6e8] sm:$0xf0]  ;;  %v3412_v15 = vor.u32 %v3769_v9, %v3409_v10 }
 0x117   :  { %2286 = vmatpush.bf16.msra.mxu2 %v3316_v16  ;;  %2255 = vmatmul.bf16.vlgmr.msrb.gmra.mxu3 %v3960_v22  ;;  %v2010_v22 = vadd.f32 %v2009_v56, %v373_v45  ;;  %v3244_v60 = vor.u32 %v3727_v53, %v3241_v19  ;;  %v3001_v16 = vld [vmem:[#allocation5 + $0x508] sm:$0xf0]  ;;  %v2788_v45 = vor.u32 %v3613_v33, %v2785_v34  ;;  %v3703_v53 = vld [vmem:[#allocation5 + $0x614] sm:$0xf] }
 0x118   :  { %2299 = vmatpush.bf16.msra.mxu3 %v3508_v24  ;;  %v3763_v24 = vld [vmem:[#allocation5 + $0x7f4] sm:$0xf]  ;;  %v3145_v19 = vld [vmem:[#allocation5 + $0x628] sm:$0xf0] }
 0x119   :  { %2261 = vmatpush.bf16.msra.mxu0 %v2908_v30  ;;  %v2023_v5 = vadd.f32 %v2022_v59, %v2010_v22  ;;  %v2035_v23 = vpop.f32.mrf.mxu2  ;;  %v2011_v26 = vpop.f32.mrf.mxu0  ;;  %v3388_v40 = vor.u32 %v3763_v24, %v3385_v25  ;;  %v3337_v56 = vld [vmem:[#allocation5 + $0x7a8] sm:$0xf0]  ;;  %v2764_v22 = vor.u32 %v3607_v48, %v2761_v49  ;;  %v2956_v59 = vor.u32 %v3655_v50, %v2953_v52 }
 0x11a   :  { %2274 = vmatpush.bf16.msra.mxu1 %v3100_v31  ;;  %v2048_v28 = vpop.f32.mrf.mxu3  ;;  %v2024_v30 = vpop.f32.mrf.mxu1  ;;  %v3004_v31 = vor.u32 %v3667_v14, %v3001_v16  ;;  %v2323_v25 = vperm.slane %v4006_v8, 3 }
 0x11b   :  { %2287 = vmatpush.bf16.msra.mxu2 %v3292_v32  ;;  %v2036_v27 = vadd.f32 %v2035_v23, %v2023_v5  ;;  %v3196_v32 = vor.u32 %v3715_v17, %v3193_v21 }
 0x11c   :  { %2300 = vmatpush.bf16.msra.mxu3 %v3484_v37 }
 0x11d   :  { %2262 = vmatpush.bf16.msra.mxu0 %v2884_v6  ;;  %v2049_v37 = vadd.f32 %v2048_v28, %v2036_v27  ;;  %v3361_v6 = vld [vmem:[#allocation5 + $0x7d8] sm:$0xf0] }
 0x11e   :  { %2275 = vmatpush.bf16.msra.mxu1 %v3076_v46  ;;  %v2980_v46 = vor.u32 %v3661_v36, %v2977_v41 }
 0x11f   :  { %2288 = vmatpush.bf16.msra.mxu2 %v3268_v47  ;;  %v3172_v47 = vor.u32 %v3709_v42, %v3169_v43 }
 0x120   :  { %2301 = vmatpush.bf16.msra.mxu3 %v3460_v51  ;;  %v3364_v51 = vor.u32 %v3757_v44, %v3361_v6  ;;  %v375_v6 = vperm.slane %v3803_v2, 4 }
 0x121   :  { %2263 = vmatpush.bf16.msra.mxu0 %v2860_v57  ;;  %v2037_v54 = vpop.f32.mrf.mxu2 }
 0x122   :  { %2276 = vmatpush.bf16.msra.mxu1 %v3052_v7  ;;  %v2050_v57 = vpop.f32.mrf.mxu3  ;;  %v3148_v7 = vor.u32 %v3703_v53, %v3145_v19  ;;  %v376_v19 = vperm.slane %v3803_v2, 5  ;;  %v2325_v2 = vperm.slane %v4006_v8, 5 }
 0x123   :  { %2289 = vmatpush.bf16.msra.mxu2 %v3244_v60  ;;  %v3340_v60 = vor.u32 %v3751_v55, %v3337_v56 }
 0x124   :  { %2302 = vmatpush.bf16.msra.mxu3 %v3436_v0 }
 0x125   :  { %2264 = vmatpush.bf16.msra.mxu0 %v2836_v39 }
 0x126   :  { %2277 = vmatpush.bf16.msra.mxu1 %v3028_v3 }
 0x127   :  { %2290 = vmatpush.bf16.msra.mxu2 %v3220_v11 }
 0x128   :  { %2303 = vmatpush.bf16.msra.mxu3 %v3412_v15 }
 0x129   :  { %2265 = vmatpush.bf16.msra.mxu0 %v2812_v29 }
 0x12a   :  { %2278 = vmatpush.bf16.msra.mxu1 %v3004_v31 }
 0x12b   :  { %2291 = vmatpush.bf16.msra.mxu2 %v3196_v32 }
 0x12c   :  { %2304 = vmatpush.bf16.msra.mxu3 %v3388_v40 }
 0x12d   :  { %2266 = vmatpush.bf16.msra.mxu0 %v2788_v45 }
 0x12e   :  { %2279 = vmatpush.bf16.msra.mxu1 %v2980_v46 }
 0x12f   :  { %2292 = vmatpush.bf16.msra.mxu2 %v3172_v47 }
 0x130   :  { %2305 = vmatpush.bf16.msra.mxu3 %v3364_v51 }
 0x131   :  { %2267 = vmatpush.bf16.msra.mxu0 %v2764_v22  ;;  %v2061_v61 = vpop.f32.mrf.mxu0 }
 0x132   :  { %2280 = vmatpush.bf16.msra.mxu1 %v2956_v59  ;;  %v2062_v62 = vadd.f32 %v2061_v61, %v2049_v37  ;;  %v2074_v63 = vpop.f32.mrf.mxu1 }
 0x133   :  { %2293 = vmatpush.bf16.msra.mxu2 %v3148_v7 }
 0x134   :  { %2306 = vmatpush.bf16.msra.mxu3 %v3340_v60  ;;  %2268 = vmatmul.bf16.vlgmr.msra.gmra.mxu0 %v3954_v18  ;;  %v2075_v0 = vadd.f32 %v2074_v63, %v2062_v62  ;;  %v2324_v62 = vperm.slane %v4006_v8, 4 }
 0x135   :  { %2281 = vmatmul.bf16.vlgmr.msra.gmra.mxu1 %v3958_v20 }
 0x136   :  { %2294 = vmatmul.bf16.vlgmr.msra.gmra.mxu2 %v3966_v35  ;;  %v2314_v5 = vmax.f32 %v2075_v0, 0.0 }
 0x137   :  { %2307 = vmatmul.bf16.vlgmr.msra.gmra.mxu3 %v3968_v38 }
 0x138   :  { %v2334_v9 = vmul.f32 %v2322_v1, %v2314_v5 }
 0x139   :  { %v2087_v10 = vpop.f32.mrf.mxu2  ;;  %v2063_v18 = vpop.f32.mrf.mxu0 }
 0x13a   :  { %v2088_v39 = vadd.f32 %v2087_v10, %v374_v4  ;;  %v2100_v3 = vpop.f32.mrf.mxu3  ;;  %v2339_v20 = vadd.f32 %v4011_v58, %v2334_v9  ;;  %v2076_v11 = vpop.f32.mrf.mxu1 }
 0x13c   :  { %v2101_v35 = vadd.f32 %v2100_v3, %v2088_v39 }
 0x141   :  { %v2089_v12 = vpop.f32.mrf.mxu2 }
 0x142   :  { %v2102_v38 = vpop.f32.mrf.mxu3 }
 0x143   :  { %v2346_v38 = vstv %s4037_s4 }
 0x151   :  { %v2113_v13 = vpop.f32.mrf.mxu0 }
 0x152   :  { %v2114_v14 = vadd.f32 %v2113_v13, %v2101_v35  ;;  %v2126_v15 = vpop.f32.mrf.mxu1 }
 0x154   :  { %v2127_v16 = vadd.f32 %v2126_v15, %v2114_v14 }
 0x159   :  { %v2139_v17 = vpop.f32.mrf.mxu2  ;;  %v2115_v26 = vpop.f32.mrf.mxu0 }
 0x15a   :  { %v2140_v21 = vadd.f32 %v2139_v17, %v2127_v16  ;;  %v2152_v23 = vpop.f32.mrf.mxu3  ;;  %v2128_v27 = vpop.f32.mrf.mxu1 }
 0x15c   :  { %v2153_v24 = vadd.f32 %v2152_v23, %v2140_v21 }
 0x15e   :  { %v2315_v28 = vmax.f32 %v2153_v24, 0.0 }
 0x160   :  { %v2335_v29 = vmul.f32 %v2323_v25, %v2315_v28 }
 0x161   :  { %v2141_v30 = vpop.f32.mrf.mxu2 }
 0x162   :  { %v2154_v58 = vpop.f32.mrf.mxu3  ;;  %v2340_v31 = vadd.f32 %v2339_v20, %v2335_v29 }
 0x171   :  { %v2165_v32 = vpop.f32.mrf.mxu0 }
 0x172   :  { %v2178_v33 = vpop.f32.mrf.mxu1  ;;  %v2166_v49 = vadd.f32 %v2165_v32, %v375_v6 }
 0x174   :  { %v2179_v50 = vadd.f32 %v2178_v33, %v2166_v49 }
 0x179   :  { %v2191_v34 = vpop.f32.mrf.mxu2  ;;  %v2167_v36 = vpop.f32.mrf.mxu0 }
 0x17a   :  { %v2204_v37 = vpop.f32.mrf.mxu3  ;;  %v2180_v40 = vpop.f32.mrf.mxu1  ;;  %v2192_v53 = vadd.f32 %v2191_v34, %v2179_v50 }
 0x17c   :  { %v2205_v54 = vadd.f32 %v2204_v37, %v2192_v53 }
 0x181   :  { %v2193_v41 = vpop.f32.mrf.mxu2 }
 0x182   :  { %v2206_v42 = vpop.f32.mrf.mxu3 }
 0x191   :  { %v2217_v43 = vpop.f32.mrf.mxu0 }
 0x192   :  { %v2230_v44 = vpop.f32.mrf.mxu1  ;;  %v2218_v56 = vadd.f32 %v2217_v43, %v2205_v54 }
 0x194   :  { %v2231_v7 = vadd.f32 %v2230_v44, %v2218_v56 }
 0x196   :  { %v2316_v61 = vmax.f32 %v2231_v7, 0.0 }
 0x198   :  { %v2336_v10 = vmul.f32 %v2324_v62, %v2316_v61 }
 0x199   :  { %v2243_v45 = vpop.f32.mrf.mxu2  ;;  %v2219_v47 = vpop.f32.mrf.mxu0 }
 0x19a   :  { %v2256_v46 = vpop.f32.mrf.mxu3  ;;  %v2232_v48 = vpop.f32.mrf.mxu1  ;;  %v2244_v55 = vadd.f32 %v2243_v45, %v376_v19  ;;  %v2341_v20 = vadd.f32 %v2340_v31, %v2336_v10 }
 0x19c   :  { %v2257_v57 = vadd.f32 %v2256_v46, %v2244_v55 }
 0x1a1   :  { %v2245_v51 = vpop.f32.mrf.mxu2 }
 0x1a2   :  { %v2258_v52 = vpop.f32.mrf.mxu3 }
 0x1b1   :  { %v2269_v22 = vpop.f32.mrf.mxu0 }
 0x1b2   :  { %v2282_v59 = vpop.f32.mrf.mxu1  ;;  %v2270_v60 = vadd.f32 %v2269_v22, %v2257_v57 }
 0x1b4   :  { %v2283_v63 = vadd.f32 %v2282_v59, %v2270_v60 }
 0x1b9   :  { %v2295_v0 = vpop.f32.mrf.mxu2  ;;  %v2271_v5 = vpop.f32.mrf.mxu0 }
 0x1ba   :  { %v2296_v1 = vadd.f32 %v2295_v0, %v2283_v63  ;;  %v2308_v4 = vpop.f32.mrf.mxu3  ;;  %v2284_v9 = vpop.f32.mrf.mxu1 }
 0x1bc   :  { %v2309_v39 = vadd.f32 %v2308_v4, %v2296_v1 }
 0x1be   :  { %v2317_v3 = vmax.f32 %v2309_v39, 0.0 }
 0x1c0   :  { %v2337_v18 = vmul.f32 %v2325_v2, %v2317_v3 }
 0x1c1   :  { %v2297_v11 = vpop.f32.mrf.mxu2 }
 0x1c2   :  { %v2310_v35 = vpop.f32.mrf.mxu3  ;;  %v2342_v12 = vadd.f32 %v2341_v20, %v2337_v18 }
 0x1c4   :  { %2343 = vadd.xlane.f32.xlu0 %v2342_v12 }
 0x237   :  { %v2344_v13 = vpop.xlane.xlu0 %2343 }
 0x238   :  { %v2347_v14 = vadd.f32 %v2346_v38, %v2344_v13 }
 0x23a   :  { %2349 = vst.msk [vmem:[%s4038_s5] sm:$0xff] %vm2348_vm0, %v2347_v14 }
 0x23b   :  { %2354 = vsyncpa [#allocation4], 1 }
 0x23c   :  { %2355 = vsyncpa [#allocation6], 1 }
 0x23d   :  { %2356 = vsyncpa [#allocation9], 1 }

</bundles_post_ra>
